<compile_context>
chip_gen: v7x
topology: tpu7x:2x2x1
jax: 0.10.0
libtpu: 0.0.40
codegen_flags: <defaults>
</compile_context>

<pallas_src>
import functools
import numpy as np

import jax
import jax.numpy as jnp
from jax.experimental import pallas as pl
from jax.experimental.pallas import tpu as pltpu


# -----------------------------------------------------------------------------
# Pallas kernel: one block of BB batch elements per grid step, recurrence
# unrolled over max_step (static).
# -----------------------------------------------------------------------------
def mac_kernel(ctx_ref, paq_ref, know_ref,
               wcq_c_ref,                         # ControlUnit.control_question (control half)
               wca_ref, bca_ref,                  # ControlUnit.attn (row weight, scalar bias in SMEM)
               wmem_ref, bmem_ref,                # ReadUnit.mem
               wrc_m_ref, wrc_k_ref, brc_ref,     # ReadUnit.concat (split halves)
               wra_ref, bra_ref,                  # ReadUnit.attn (row weight, scalar bias in SMEM)
               wwc_r_ref, wwc_m_ref, bwc_ref,     # WriteUnit.concat (split halves)
               out_ref,
               *, max_step):
    ctx = ctx_ref[...]            # (BB, S, D)
    know = know_ref[...]          # (BB, K, D)
    BB, S, D = ctx.shape
    K = know.shape[1]

    # Hoist weight loads out of the unrolled loop.
    wcq_c = wcq_c_ref[...]
    wca_row = wca_ref[...]                        # (1, D)
    wmem = wmem_ref[...]; bmem = bmem_ref[...]
    wrc_m = wrc_m_ref[...]
    wra_row = wra_ref[...]                        # (1, D)
    wwc_r = wwc_r_ref[...]; wwc_m = wwc_m_ref[...]; bwc = bwc_ref[...]
    bca = bca_ref[0, 0]                           # scalar (SMEM)
    bra = bra_ref[0, 0]                           # scalar (SMEM)

    # Loop-invariant ReadUnit term: know @ wrc[D:, :] + brc  (computed once per block).
    know2d = know.reshape(BB * K, D)
    know_proj = jnp.dot(know2d, wrc_k_ref[...],
                        preferred_element_type=jnp.float32) + brc_ref[...]   # (BB*K, D)

    control = jnp.zeros((BB, D), jnp.float32)     # control_0 (zeros) expanded
    memory = jnp.zeros((BB, D), jnp.float32)      # mem_0 (zeros) expanded

    def softmax_last(x):                          # softmax over the last (lane) axis
        m = jnp.max(x, axis=-1, keepdims=True)
        e = jnp.exp(x - m)
        return e / jnp.sum(e, axis=-1, keepdims=True)

    for i in range(max_step):                     # static -> fully unrolled
        # ------------------ ControlUnit ------------------
        # paq[i] already contains (question @ wpos[i] + bpos[i]) @ wcq[D:] + bcq.
        cq = jnp.dot(control, wcq_c,
                     preferred_element_type=jnp.float32) + paq_ref[i]        # (BB, D)
        cqw = (cq * wca_row)[:, None, :]                                     # fold attn weight -> (BB,1,D)
        aw = jnp.einsum('bqd,bsd->bqs', cqw, ctx,
                        preferred_element_type=jnp.float32) + bca            # (BB, 1, S)
        attn = softmax_last(aw)
        control = jnp.einsum('bqs,bsd->bqd', attn, ctx,
                             preferred_element_type=jnp.float32)[:, 0, :]    # (BB, D)

        # ------------------ ReadUnit ------------------
        mem_p = jnp.dot(memory, wmem,
                        preferred_element_type=jnp.float32) + bmem           # (BB, D)
        minfo = (mem_p[:, None, :] * know).reshape(BB * K, D)                # (BB*K, D)
        rc = (jnp.dot(minfo, wrc_m, preferred_element_type=jnp.float32)
              + know_proj).reshape(BB, K, D)                                 # (BB, K, D)
        cw = (control * wra_row)[:, None, :]                                 # (BB, 1, D)
        ra = jnp.einsum('bqd,bkd->bqk', cw, rc,
                        preferred_element_type=jnp.float32) + bra            # (BB, 1, K)
        rattn = softmax_last(ra)
        read = jnp.einsum('bqk,bkd->bqd', rattn, know,
                          preferred_element_type=jnp.float32)[:, 0, :]       # (BB, D)

        # ------------------ WriteUnit (no self-attn / gate) ------------------
        memory = (jnp.dot(read, wwc_r, preferred_element_type=jnp.float32)
                  + jnp.dot(memory, wwc_m, preferred_element_type=jnp.float32)
                  + bwc)                                                     # (BB, D)

    out_ref[...] = memory


# -----------------------------------------------------------------------------
# Wrapper
# -----------------------------------------------------------------------------
def _pick_block_b(B, cap=64):
    """Largest batch block <= cap that divides B; partial blocks must be mult of 8."""
    if B <= cap:
        return B
    for bb in range(cap, 0, -1):
        if B % bb == 0 and bb % 8 == 0:
            return bb
    return B


def mac_forward(context, question, knowledge, params, max_step, block_b=None):
    """knowledge follows the PyTorch layout [B, D, K]."""
    (wpos, bpos, wcq, bcq, wca, bca, wmem, bmem,
     wrc, brc, wra, bra, wwc, bwc) = params
    B, S, D = context.shape
    know_kd = jnp.transpose(knowledge, (0, 2, 1))                 # [B, K, D]
    K = know_kd.shape[1]

    # Precompute the position-aware path for every step outside the kernel and
    # push it through the `pa` half of control_question too (one batched XLA
    # matmul; the per-step weight stack never enters kernel VMEM).
    # Layout (T, B, D) so the kernel picks step t with a leading-dim index.
    pa_all = jnp.einsum('bq,tqd->tbd', question, wpos) + bpos[:, None, :]      # (T, B, D)
    paq = jnp.einsum('tbd,de->tbe', pa_all, wcq[D:, :]) + bcq[None, :, :]      # (T, B, D)

    # Split concat linears into halves
    # (concat order: [control, pa], [mem*know, know], [read, memory]).
    wcq_c = wcq[:D, :]
    wrc_m, wrc_k = wrc[:D, :], wrc[D:, :]
    wwc_r, wwc_m = wwc[:D, :], wwc[D:, :]
    wca_row = wca.reshape(1, D)
    wra_row = wra.reshape(1, D)
    bca_s = bca.reshape(1, 1)
    bra_s = bra.reshape(1, 1)

    if block_b is None:
        block_b = _pick_block_b(B)
    assert B % block_b == 0
    if block_b != B:
        assert block_b % 8 == 0, "partial batch blocks must be multiples of 8"
    grid = (B // block_b,)

    def full(shape):
        return pl.BlockSpec(shape, lambda b: (0,) * len(shape))

    smem_scalar = pl.BlockSpec(memory_space=pltpu.MemorySpace.SMEM)

    in_specs = [
        pl.BlockSpec((block_b, S, D), lambda b: (b, 0, 0)),          # context
        pl.BlockSpec((max_step, block_b, D), lambda b: (0, b, 0)),   # paq (T, B, D)
        pl.BlockSpec((block_b, K, D), lambda b: (b, 0, 0)),          # knowledge [B, K, D]
        full((D, D)),                                                # control_question (control half)
        full((1, D)), smem_scalar,                                   # control attn row + scalar bias
        full((D, D)), full((1, D)),                                  # read mem
        full((D, D)), full((D, D)), full((1, D)),                    # read concat halves + bias
        full((1, D)), smem_scalar,                                   # read attn row + scalar bias
        full((D, D)), full((D, D)), full((1, D)),                    # write concat halves + bias
    ]

    out = pl.pallas_call(
        functools.partial(mac_kernel, max_step=max_step),
        out_shape=jax.ShapeDtypeStruct((B, D), jnp.float32),
        grid=grid,
        in_specs=in_specs,
        out_specs=pl.BlockSpec((block_b, D), lambda b: (b, 0)),
        compiler_params=pltpu.CompilerParams(
            dimension_semantics=("parallel",)),
    )(context, paq, know_kd,
      wcq_c, wca_row, bca_s,
      wmem, bmem, wrc_m, wrc_k, brc, wra_row, bra_s,
      wwc_r, wwc_m, bwc)
    return out


# -----------------------------------------------------------------------------
# Pure-JAX reference (same math as the PyTorch module, batched) for checking.
# -----------------------------------------------------------------------------
def mac_reference(context, question, knowledge, params, max_step):
    (wpos, bpos, wcq, bcq, wca, bca, wmem, bmem,
     wrc, brc, wra, bra, wwc, bwc) = params
    B, S, D = context.shape
    know_kd = jnp.transpose(knowledge, (0, 2, 1))                 # [B, K, D]
    control = jnp.zeros((B, D), jnp.float32)
    memory = jnp.zeros((B, D), jnp.float32)
    for i in range(max_step):
        pa = question @ wpos[i] + bpos[i]
        cq = jnp.concatenate([control, pa], axis=1) @ wcq + bcq
        aw = (cq[:, None, :] * context) @ wca + bca
        attn = jax.nn.softmax(aw, axis=1)
        control = jnp.sum(attn * context, axis=1)

        mem_p = memory @ wmem + bmem
        cat = jnp.concatenate([mem_p[:, None, :] * know_kd, know_kd], axis=2)
        rc = cat @ wrc + brc
        ra = (rc * control[:, None, :]) @ wra + bra
        rattn = jax.nn.softmax(ra, axis=1)
        read = jnp.sum(rattn * know_kd, axis=1)

        memory = jnp.concatenate([read, memory], axis=1) @ wwc + bwc
    return memory


def xavier_uniform(key, in_dim, out_dim):
    bound = float(np.sqrt(6.0 / (in_dim + out_dim)))
    return jax.random.uniform(key, (in_dim, out_dim), jnp.float32, -bound, bound)


if __name__ == "__main__":
    B, D, S, K, MAX_STEP = 2, 32, 8, 16, 3

    key = jax.random.PRNGKey(0)
    keys = jax.random.split(key, 12)

    context = jax.random.normal(keys[0], (B, S, D), jnp.float32)
    question = jax.random.normal(keys[1], (B, 2 * D), jnp.float32)
    knowledge = jax.random.normal(keys[2], (B, D, K), jnp.float32)   # PyTorch layout [B, D, K]

    # Parameters (weights stored [in, out]; biases zero — matching linear()).
    pos_keys = jax.random.split(keys[3], MAX_STEP)
    wpos = jnp.stack([xavier_uniform(k, 2 * D, D) for k in pos_keys])
    bpos = jnp.zeros((MAX_STEP, D), jnp.float32)
    wcq = xavier_uniform(keys[4], 2 * D, D); bcq = jnp.zeros((1, D), jnp.float32)
    wca = xavier_uniform(keys[5], D, 1);     bca = jnp.zeros((1, 1), jnp.float32)
    wmem = xavier_uniform(keys[6], D, D);    bmem = jnp.zeros((1, D), jnp.float32)
    wrc = xavier_uniform(keys[7], 2 * D, D); brc = jnp.zeros((1, D), jnp.float32)
    wra = xavier_uniform(keys[8], D, 1);     bra = jnp.zeros((1, 1), jnp.float32)
    wwc = xavier_uniform(keys[9], 2 * D, D); bwc = jnp.zeros((1, D), jnp.float32)

    params = (wpos, bpos, wcq, bcq, wca, bca, wmem, bmem,
              wrc, brc, wra, bra, wwc, bwc)

    out = mac_forward(context, question, knowledge, params, MAX_STEP)
    out = jax.block_until_ready(out)

    ref = mac_reference(context, question, knowledge, params, MAX_STEP)
    np.testing.assert_allclose(np.asarray(out), np.asarray(ref), rtol=1e-3, atol=1e-4)

    print("KERNEL_OK")
</pallas_src>

<mosaic_0001>
module attributes {stable_mosaic.version = 11 : i64} {
  func.func @mac_kernel(%arg0: i32, %arg1: memref<2x8x32xf32, #tpu.memory_space<vmem>>, %arg2: memref<3x2x32xf32, #tpu.memory_space<vmem>>, %arg3: memref<2x16x32xf32, #tpu.memory_space<vmem>>, %arg4: memref<32x32xf32, #tpu.memory_space<vmem>>, %arg5: memref<1x32xf32, #tpu.memory_space<vmem>>, %arg6: memref<1x1xf32, #tpu.memory_space<smem>>, %arg7: memref<32x32xf32, #tpu.memory_space<vmem>>, %arg8: memref<1x32xf32, #tpu.memory_space<vmem>>, %arg9: memref<32x32xf32, #tpu.memory_space<vmem>>, %arg10: memref<32x32xf32, #tpu.memory_space<vmem>>, %arg11: memref<1x32xf32, #tpu.memory_space<vmem>>, %arg12: memref<1x32xf32, #tpu.memory_space<vmem>>, %arg13: memref<1x1xf32, #tpu.memory_space<smem>>, %arg14: memref<32x32xf32, #tpu.memory_space<vmem>>, %arg15: memref<32x32xf32, #tpu.memory_space<vmem>>, %arg16: memref<1x32xf32, #tpu.memory_space<vmem>>, %arg17: memref<2x32xf32, #tpu.memory_space<vmem>>) attributes {dimension_semantics = [#tpu.dimension_semantics<parallel>], iteration_bounds = array<i64: 1>, scalar_prefetch = 0 : i64, scratch_operands = 0 : i64, tpu.core_type = #tpu.core_type<tc>, window_params = [{transform_indices = @transform_0, window_bounds = array<i64: 2, 8, 32>}, {transform_indices = @transform_1, window_bounds = array<i64: 3, 2, 32>}, {transform_indices = @transform_2, window_bounds = array<i64: 2, 16, 32>}, {pipeline_mode = #tpu.pipeline_mode<synchronous>, transform_indices = @transform_3, window_bounds = array<i64: 32, 32>}, {pipeline_mode = #tpu.pipeline_mode<synchronous>, transform_indices = @transform_4, window_bounds = array<i64: 1, 32>}, {transform_indices = @transform_5, window_bounds = array<i64: 1, 1>}, {pipeline_mode = #tpu.pipeline_mode<synchronous>, transform_indices = @transform_6, window_bounds = array<i64: 32, 32>}, {pipeline_mode = #tpu.pipeline_mode<synchronous>, transform_indices = @transform_7, window_bounds = array<i64: 1, 32>}, {pipeline_mode = #tpu.pipeline_mode<synchronous>, transform_indices = @transform_8, window_bounds = array<i64: 32, 32>}, {pipeline_mode = #tpu.pipeline_mode<synchronous>, transform_indices = @transform_9, window_bounds = array<i64: 32, 32>}, {pipeline_mode = #tpu.pipeline_mode<synchronous>, transform_indices = @transform_10, window_bounds = array<i64: 1, 32>}, {pipeline_mode = #tpu.pipeline_mode<synchronous>, transform_indices = @transform_11, window_bounds = array<i64: 1, 32>}, {transform_indices = @transform_12, window_bounds = array<i64: 1, 1>}, {pipeline_mode = #tpu.pipeline_mode<synchronous>, transform_indices = @transform_13, window_bounds = array<i64: 32, 32>}, {pipeline_mode = #tpu.pipeline_mode<synchronous>, transform_indices = @transform_14, window_bounds = array<i64: 32, 32>}, {pipeline_mode = #tpu.pipeline_mode<synchronous>, transform_indices = @transform_15, window_bounds = array<i64: 1, 32>}, {transform_indices = @transform_16, window_bounds = array<i64: 2, 32>}]} {
    %c0 = arith.constant 0 : index
    %c0_0 = arith.constant 0 : index
    %c0_1 = arith.constant 0 : index
    %0 = vector.load %arg1[%c0, %c0_0, %c0_1] : memref<2x8x32xf32, #tpu.memory_space<vmem>>, vector<2x8x32xf32>
    %c0_2 = arith.constant 0 : index
    %c0_3 = arith.constant 0 : index
    %c0_4 = arith.constant 0 : index
    %1 = vector.load %arg3[%c0_2, %c0_3, %c0_4] : memref<2x16x32xf32, #tpu.memory_space<vmem>>, vector<2x16x32xf32>
    %c0_5 = arith.constant 0 : index
    %c0_6 = arith.constant 0 : index
    %2 = vector.load %arg4[%c0_5, %c0_6] : memref<32x32xf32, #tpu.memory_space<vmem>>, vector<32x32xf32>
    %c0_7 = arith.constant 0 : index
    %c0_8 = arith.constant 0 : index
    %3 = vector.load %arg5[%c0_7, %c0_8] : memref<1x32xf32, #tpu.memory_space<vmem>>, vector<1x32xf32>
    %c0_9 = arith.constant 0 : index
    %c0_10 = arith.constant 0 : index
    %4 = vector.load %arg7[%c0_9, %c0_10] : memref<32x32xf32, #tpu.memory_space<vmem>>, vector<32x32xf32>
    %c0_11 = arith.constant 0 : index
    %c0_12 = arith.constant 0 : index
    %5 = vector.load %arg8[%c0_11, %c0_12] : memref<1x32xf32, #tpu.memory_space<vmem>>, vector<1x32xf32>
    %c0_13 = arith.constant 0 : index
    %c0_14 = arith.constant 0 : index
    %6 = vector.load %arg9[%c0_13, %c0_14] : memref<32x32xf32, #tpu.memory_space<vmem>>, vector<32x32xf32>
    %c0_15 = arith.constant 0 : index
    %c0_16 = arith.constant 0 : index
    %7 = vector.load %arg12[%c0_15, %c0_16] : memref<1x32xf32, #tpu.memory_space<vmem>>, vector<1x32xf32>
    %c0_17 = arith.constant 0 : index
    %c0_18 = arith.constant 0 : index
    %8 = vector.load %arg14[%c0_17, %c0_18] : memref<32x32xf32, #tpu.memory_space<vmem>>, vector<32x32xf32>
    %c0_19 = arith.constant 0 : index
    %c0_20 = arith.constant 0 : index
    %9 = vector.load %arg15[%c0_19, %c0_20] : memref<32x32xf32, #tpu.memory_space<vmem>>, vector<32x32xf32>
    %c0_21 = arith.constant 0 : index
    %c0_22 = arith.constant 0 : index
    %10 = vector.load %arg16[%c0_21, %c0_22] : memref<1x32xf32, #tpu.memory_space<vmem>>, vector<1x32xf32>
    %c0_23 = arith.constant 0 : index
    %c0_24 = arith.constant 0 : index
    %11 = memref.load %arg6[%c0_23, %c0_24] : memref<1x1xf32, #tpu.memory_space<smem>>
    %c0_25 = arith.constant 0 : index
    %c0_26 = arith.constant 0 : index
    %12 = memref.load %arg13[%c0_25, %c0_26] : memref<1x1xf32, #tpu.memory_space<smem>>
    %13 = vector.shape_cast %1 : vector<2x16x32xf32> to vector<32x32xf32>
    %c0_27 = arith.constant 0 : index
    %c0_28 = arith.constant 0 : index
    %14 = vector.load %arg10[%c0_27, %c0_28] : memref<32x32xf32, #tpu.memory_space<vmem>>, vector<32x32xf32>
    %cst = arith.constant dense<0.000000e+00> : vector<32x32xf32>
    %15 = tpu.matmul %13, %14, %cst {dimension_numbers = #tpu.dot_dimension_numbers<[1], [0], [0], [1], [0, 0, 1, 1], [], []>} : vector<32x32xf32>, vector<32x32xf32>, vector<32x32xf32> -> vector<32x32xf32>
    %c0_29 = arith.constant 0 : index
    %c0_30 = arith.constant 0 : index
    %16 = vector.load %arg11[%c0_29, %c0_30] : memref<1x32xf32, #tpu.memory_space<vmem>>, vector<1x32xf32>
    %17 = vector.broadcast %16 : vector<1x32xf32> to vector<32x32xf32>
    %18 = arith.addf %15, %17 : vector<32x32xf32>
    %cst_31 = arith.constant 0.000000e+00 : f32
    %19 = vector.broadcast %cst_31 : f32 to vector<2x32xf32>
    %cst_32 = arith.constant 0.000000e+00 : f32
    %20 = vector.broadcast %cst_32 : f32 to vector<2x32xf32>
    %cst_33 = arith.constant dense<0.000000e+00> : vector<2x32xf32>
    %21 = tpu.matmul %19, %2, %cst_33 {dimension_numbers = #tpu.dot_dimension_numbers<[1], [0], [0], [1], [0, 0, 1, 1], [], []>} : vector<2x32xf32>, vector<32x32xf32>, vector<2x32xf32> -> vector<2x32xf32>
    %c0_34 = arith.constant 0 : index
    %c0_35 = arith.constant 0 : index
    %c0_36 = arith.constant 0 : index
    %22 = vector.load %arg2[%c0_34, %c0_35, %c0_36] : memref<3x2x32xf32, #tpu.memory_space<vmem>>, vector<1x2x32xf32>
    %23 = vector.shape_cast %22 : vector<1x2x32xf32> to vector<2x32xf32>
    %24 = arith.addf %21, %23 : vector<2x32xf32>
    %25 = vector.broadcast %3 : vector<1x32xf32> to vector<2x32xf32>
    %26 = arith.mulf %24, %25 : vector<2x32xf32>
    %27 = vector.shape_cast %26 : vector<2x32xf32> to vector<2x1x32xf32>
    "tpu.trace_start"() <{level = 10 : i32, message = "bqd,bsd->bqs"}> : () -> ()
    %cst_37 = arith.constant dense<0.000000e+00> : vector<2x1x8xf32>
    %28 = tpu.matmul %27, %0, %cst_37 {dimension_numbers = #tpu.dot_dimension_numbers<[2], [2], [1], [1], [0, 0, 0, 1, 1, 1], [0], [0]>} : vector<2x1x32xf32>, vector<2x8x32xf32>, vector<2x1x8xf32> -> vector<2x1x8xf32>
    "tpu.trace_stop"() : () -> ()
    %29 = vector.broadcast %11 : f32 to vector<2x1x8xf32>
    %30 = arith.addf %28, %29 : vector<2x1x8xf32>
    %cst_38 = arith.constant dense<0xFF800000> : vector<2x1xf32>
    %31 = vector.multi_reduction <maximumf>, %30, %cst_38 [2] : vector<2x1x8xf32> to vector<2x1xf32>
    %32 = vector.shape_cast %31 : vector<2x1xf32> to vector<2x1x1xf32>
    %33 = vector.broadcast %32 : vector<2x1x1xf32> to vector<2x1x8xf32>
    %34 = arith.subf %30, %33 : vector<2x1x8xf32>
    %35 = math.exp %34 : vector<2x1x8xf32>
    %cst_39 = arith.constant dense<0.000000e+00> : vector<2x1xf32>
    %36 = vector.multi_reduction <add>, %35, %cst_39 [2] : vector<2x1x8xf32> to vector<2x1xf32>
    %37 = vector.shape_cast %36 : vector<2x1xf32> to vector<2x1x1xf32>
    %38 = vector.broadcast %37 : vector<2x1x1xf32> to vector<2x1x8xf32>
    %39 = arith.divf %35, %38 : vector<2x1x8xf32>
    "tpu.trace_start"() <{level = 10 : i32, message = "bqs,bsd->bqd"}> : () -> ()
    %cst_40 = arith.constant dense<0.000000e+00> : vector<2x1x32xf32>
    %40 = tpu.matmul %39, %0, %cst_40 {dimension_numbers = #tpu.dot_dimension_numbers<[2], [1], [1], [2], [0, 0, 0, 1, 1, 2], [0], [0]>} : vector<2x1x8xf32>, vector<2x8x32xf32>, vector<2x1x32xf32> -> vector<2x1x32xf32>
    "tpu.trace_stop"() : () -> ()
    %41 = vector.shape_cast %40 : vector<2x1x32xf32> to vector<2x32xf32>
    %cst_41 = arith.constant dense<0.000000e+00> : vector<2x32xf32>
    %42 = tpu.matmul %20, %4, %cst_41 {dimension_numbers = #tpu.dot_dimension_numbers<[1], [0], [0], [1], [0, 0, 1, 1], [], []>} : vector<2x32xf32>, vector<32x32xf32>, vector<2x32xf32> -> vector<2x32xf32>
    %43 = vector.broadcast %5 : vector<1x32xf32> to vector<2x32xf32>
    %44 = arith.addf %42, %43 : vector<2x32xf32>
    %45 = vector.shape_cast %44 : vector<2x32xf32> to vector<2x1x32xf32>
    %46 = vector.broadcast %45 : vector<2x1x32xf32> to vector<2x16x32xf32>
    %47 = arith.mulf %46, %1 : vector<2x16x32xf32>
    %48 = vector.shape_cast %47 : vector<2x16x32xf32> to vector<32x32xf32>
    %cst_42 = arith.constant dense<0.000000e+00> : vector<32x32xf32>
    %49 = tpu.matmul %48, %6, %cst_42 {dimension_numbers = #tpu.dot_dimension_numbers<[1], [0], [0], [1], [0, 0, 1, 1], [], []>} : vector<32x32xf32>, vector<32x32xf32>, vector<32x32xf32> -> vector<32x32xf32>
    %50 = arith.addf %49, %18 : vector<32x32xf32>
    %51 = vector.shape_cast %50 : vector<32x32xf32> to vector<2x16x32xf32>
    %52 = vector.broadcast %7 : vector<1x32xf32> to vector<2x32xf32>
    %53 = arith.mulf %41, %52 : vector<2x32xf32>
    %54 = vector.shape_cast %53 : vector<2x32xf32> to vector<2x1x32xf32>
    "tpu.trace_start"() <{level = 10 : i32, message = "bqd,bkd->bqk"}> : () -> ()
    %cst_43 = arith.constant dense<0.000000e+00> : vector<2x1x16xf32>
    %55 = tpu.matmul %54, %51, %cst_43 {dimension_numbers = #tpu.dot_dimension_numbers<[2], [2], [1], [1], [0, 0, 0, 1, 1, 1], [0], [0]>} : vector<2x1x32xf32>, vector<2x16x32xf32>, vector<2x1x16xf32> -> vector<2x1x16xf32>
    "tpu.trace_stop"() : () -> ()
    %56 = vector.broadcast %12 : f32 to vector<2x1x16xf32>
    %57 = arith.addf %55, %56 : vector<2x1x16xf32>
    %cst_44 = arith.constant dense<0xFF800000> : vector<2x1xf32>
    %58 = vector.multi_reduction <maximumf>, %57, %cst_44 [2] : vector<2x1x16xf32> to vector<2x1xf32>
    %59 = vector.shape_cast %58 : vector<2x1xf32> to vector<2x1x1xf32>
    %60 = vector.broadcast %59 : vector<2x1x1xf32> to vector<2x1x16xf32>
    %61 = arith.subf %57, %60 : vector<2x1x16xf32>
    %62 = math.exp %61 : vector<2x1x16xf32>
    %cst_45 = arith.constant dense<0.000000e+00> : vector<2x1xf32>
    %63 = vector.multi_reduction <add>, %62, %cst_45 [2] : vector<2x1x16xf32> to vector<2x1xf32>
    %64 = vector.shape_cast %63 : vector<2x1xf32> to vector<2x1x1xf32>
    %65 = vector.broadcast %64 : vector<2x1x1xf32> to vector<2x1x16xf32>
    %66 = arith.divf %62, %65 : vector<2x1x16xf32>
    "tpu.trace_start"() <{level = 10 : i32, message = "bqk,bkd->bqd"}> : () -> ()
    %cst_46 = arith.constant dense<0.000000e+00> : vector<2x1x32xf32>
    %67 = tpu.matmul %66, %1, %cst_46 {dimension_numbers = #tpu.dot_dimension_numbers<[2], [1], [1], [2], [0, 0, 0, 1, 1, 2], [0], [0]>} : vector<2x1x16xf32>, vector<2x16x32xf32>, vector<2x1x32xf32> -> vector<2x1x32xf32>
    "tpu.trace_stop"() : () -> ()
    %68 = vector.shape_cast %67 : vector<2x1x32xf32> to vector<2x32xf32>
    %cst_47 = arith.constant dense<0.000000e+00> : vector<2x32xf32>
    %69 = tpu.matmul %68, %8, %cst_47 {dimension_numbers = #tpu.dot_dimension_numbers<[1], [0], [0], [1], [0, 0, 1, 1], [], []>} : vector<2x32xf32>, vector<32x32xf32>, vector<2x32xf32> -> vector<2x32xf32>
    %cst_48 = arith.constant dense<0.000000e+00> : vector<2x32xf32>
    %70 = tpu.matmul %20, %9, %cst_48 {dimension_numbers = #tpu.dot_dimension_numbers<[1], [0], [0], [1], [0, 0, 1, 1], [], []>} : vector<2x32xf32>, vector<32x32xf32>, vector<2x32xf32> -> vector<2x32xf32>
    %71 = arith.addf %69, %70 : vector<2x32xf32>
    %72 = vector.broadcast %10 : vector<1x32xf32> to vector<2x32xf32>
    %73 = arith.addf %71, %72 : vector<2x32xf32>
    %cst_49 = arith.constant dense<0.000000e+00> : vector<2x32xf32>
    %74 = tpu.matmul %41, %2, %cst_49 {dimension_numbers = #tpu.dot_dimension_numbers<[1], [0], [0], [1], [0, 0, 1, 1], [], []>} : vector<2x32xf32>, vector<32x32xf32>, vector<2x32xf32> -> vector<2x32xf32>
    %c1 = arith.constant 1 : index
    %c0_50 = arith.constant 0 : index
    %c0_51 = arith.constant 0 : index
    %75 = vector.load %arg2[%c1, %c0_50, %c0_51] : memref<3x2x32xf32, #tpu.memory_space<vmem>>, vector<1x2x32xf32>
    %76 = vector.shape_cast %75 : vector<1x2x32xf32> to vector<2x32xf32>
    %77 = arith.addf %74, %76 : vector<2x32xf32>
    %78 = vector.broadcast %3 : vector<1x32xf32> to vector<2x32xf32>
    %79 = arith.mulf %77, %78 : vector<2x32xf32>
    %80 = vector.shape_cast %79 : vector<2x32xf32> to vector<2x1x32xf32>
    "tpu.trace_start"() <{level = 10 : i32, message = "bqd,bsd->bqs"}> : () -> ()
    %cst_52 = arith.constant dense<0.000000e+00> : vector<2x1x8xf32>
    %81 = tpu.matmul %80, %0, %cst_52 {dimension_numbers = #tpu.dot_dimension_numbers<[2], [2], [1], [1], [0, 0, 0, 1, 1, 1], [0], [0]>} : vector<2x1x32xf32>, vector<2x8x32xf32>, vector<2x1x8xf32> -> vector<2x1x8xf32>
    "tpu.trace_stop"() : () -> ()
    %82 = vector.broadcast %11 : f32 to vector<2x1x8xf32>
    %83 = arith.addf %81, %82 : vector<2x1x8xf32>
    %cst_53 = arith.constant dense<0xFF800000> : vector<2x1xf32>
    %84 = vector.multi_reduction <maximumf>, %83, %cst_53 [2] : vector<2x1x8xf32> to vector<2x1xf32>
    %85 = vector.shape_cast %84 : vector<2x1xf32> to vector<2x1x1xf32>
    %86 = vector.broadcast %85 : vector<2x1x1xf32> to vector<2x1x8xf32>
    %87 = arith.subf %83, %86 : vector<2x1x8xf32>
    %88 = math.exp %87 : vector<2x1x8xf32>
    %cst_54 = arith.constant dense<0.000000e+00> : vector<2x1xf32>
    %89 = vector.multi_reduction <add>, %88, %cst_54 [2] : vector<2x1x8xf32> to vector<2x1xf32>
    %90 = vector.shape_cast %89 : vector<2x1xf32> to vector<2x1x1xf32>
    %91 = vector.broadcast %90 : vector<2x1x1xf32> to vector<2x1x8xf32>
    %92 = arith.divf %88, %91 : vector<2x1x8xf32>
    "tpu.trace_start"() <{level = 10 : i32, message = "bqs,bsd->bqd"}> : () -> ()
    %cst_55 = arith.constant dense<0.000000e+00> : vector<2x1x32xf32>
    %93 = tpu.matmul %92, %0, %cst_55 {dimension_numbers = #tpu.dot_dimension_numbers<[2], [1], [1], [2], [0, 0, 0, 1, 1, 2], [0], [0]>} : vector<2x1x8xf32>, vector<2x8x32xf32>, vector<2x1x32xf32> -> vector<2x1x32xf32>
    "tpu.trace_stop"() : () -> ()
    %94 = vector.shape_cast %93 : vector<2x1x32xf32> to vector<2x32xf32>
    %cst_56 = arith.constant dense<0.000000e+00> : vector<2x32xf32>
    %95 = tpu.matmul %73, %4, %cst_56 {dimension_numbers = #tpu.dot_dimension_numbers<[1], [0], [0], [1], [0, 0, 1, 1], [], []>} : vector<2x32xf32>, vector<32x32xf32>, vector<2x32xf32> -> vector<2x32xf32>
    %96 = vector.broadcast %5 : vector<1x32xf32> to vector<2x32xf32>
    %97 = arith.addf %95, %96 : vector<2x32xf32>
    %98 = vector.shape_cast %97 : vector<2x32xf32> to vector<2x1x32xf32>
    %99 = vector.broadcast %98 : vector<2x1x32xf32> to vector<2x16x32xf32>
    %100 = arith.mulf %99, %1 : vector<2x16x32xf32>
    %101 = vector.shape_cast %100 : vector<2x16x32xf32> to vector<32x32xf32>
    %cst_57 = arith.constant dense<0.000000e+00> : vector<32x32xf32>
    %102 = tpu.matmul %101, %6, %cst_57 {dimension_numbers = #tpu.dot_dimension_numbers<[1], [0], [0], [1], [0, 0, 1, 1], [], []>} : vector<32x32xf32>, vector<32x32xf32>, vector<32x32xf32> -> vector<32x32xf32>
    %103 = arith.addf %102, %18 : vector<32x32xf32>
    %104 = vector.shape_cast %103 : vector<32x32xf32> to vector<2x16x32xf32>
    %105 = vector.broadcast %7 : vector<1x32xf32> to vector<2x32xf32>
    %106 = arith.mulf %94, %105 : vector<2x32xf32>
    %107 = vector.shape_cast %106 : vector<2x32xf32> to vector<2x1x32xf32>
    "tpu.trace_start"() <{level = 10 : i32, message = "bqd,bkd->bqk"}> : () -> ()
    %cst_58 = arith.constant dense<0.000000e+00> : vector<2x1x16xf32>
    %108 = tpu.matmul %107, %104, %cst_58 {dimension_numbers = #tpu.dot_dimension_numbers<[2], [2], [1], [1], [0, 0, 0, 1, 1, 1], [0], [0]>} : vector<2x1x32xf32>, vector<2x16x32xf32>, vector<2x1x16xf32> -> vector<2x1x16xf32>
    "tpu.trace_stop"() : () -> ()
    %109 = vector.broadcast %12 : f32 to vector<2x1x16xf32>
    %110 = arith.addf %108, %109 : vector<2x1x16xf32>
    %cst_59 = arith.constant dense<0xFF800000> : vector<2x1xf32>
    %111 = vector.multi_reduction <maximumf>, %110, %cst_59 [2] : vector<2x1x16xf32> to vector<2x1xf32>
    %112 = vector.shape_cast %111 : vector<2x1xf32> to vector<2x1x1xf32>
    %113 = vector.broadcast %112 : vector<2x1x1xf32> to vector<2x1x16xf32>
    %114 = arith.subf %110, %113 : vector<2x1x16xf32>
    %115 = math.exp %114 : vector<2x1x16xf32>
    %cst_60 = arith.constant dense<0.000000e+00> : vector<2x1xf32>
    %116 = vector.multi_reduction <add>, %115, %cst_60 [2] : vector<2x1x16xf32> to vector<2x1xf32>
    %117 = vector.shape_cast %116 : vector<2x1xf32> to vector<2x1x1xf32>
    %118 = vector.broadcast %117 : vector<2x1x1xf32> to vector<2x1x16xf32>
    %119 = arith.divf %115, %118 : vector<2x1x16xf32>
    "tpu.trace_start"() <{level = 10 : i32, message = "bqk,bkd->bqd"}> : () -> ()
    %cst_61 = arith.constant dense<0.000000e+00> : vector<2x1x32xf32>
    %120 = tpu.matmul %119, %1, %cst_61 {dimension_numbers = #tpu.dot_dimension_numbers<[2], [1], [1], [2], [0, 0, 0, 1, 1, 2], [0], [0]>} : vector<2x1x16xf32>, vector<2x16x32xf32>, vector<2x1x32xf32> -> vector<2x1x32xf32>
    "tpu.trace_stop"() : () -> ()
    %121 = vector.shape_cast %120 : vector<2x1x32xf32> to vector<2x32xf32>
    %cst_62 = arith.constant dense<0.000000e+00> : vector<2x32xf32>
    %122 = tpu.matmul %121, %8, %cst_62 {dimension_numbers = #tpu.dot_dimension_numbers<[1], [0], [0], [1], [0, 0, 1, 1], [], []>} : vector<2x32xf32>, vector<32x32xf32>, vector<2x32xf32> -> vector<2x32xf32>
    %cst_63 = arith.constant dense<0.000000e+00> : vector<2x32xf32>
    %123 = tpu.matmul %73, %9, %cst_63 {dimension_numbers = #tpu.dot_dimension_numbers<[1], [0], [0], [1], [0, 0, 1, 1], [], []>} : vector<2x32xf32>, vector<32x32xf32>, vector<2x32xf32> -> vector<2x32xf32>
    %124 = arith.addf %122, %123 : vector<2x32xf32>
    %125 = vector.broadcast %10 : vector<1x32xf32> to vector<2x32xf32>
    %126 = arith.addf %124, %125 : vector<2x32xf32>
    %cst_64 = arith.constant dense<0.000000e+00> : vector<2x32xf32>
    %127 = tpu.matmul %94, %2, %cst_64 {dimension_numbers = #tpu.dot_dimension_numbers<[1], [0], [0], [1], [0, 0, 1, 1], [], []>} : vector<2x32xf32>, vector<32x32xf32>, vector<2x32xf32> -> vector<2x32xf32>
    %c2 = arith.constant 2 : index
    %c0_65 = arith.constant 0 : index
    %c0_66 = arith.constant 0 : index
    %128 = vector.load %arg2[%c2, %c0_65, %c0_66] : memref<3x2x32xf32, #tpu.memory_space<vmem>>, vector<1x2x32xf32>
    %129 = vector.shape_cast %128 : vector<1x2x32xf32> to vector<2x32xf32>
    %130 = arith.addf %127, %129 : vector<2x32xf32>
    %131 = vector.broadcast %3 : vector<1x32xf32> to vector<2x32xf32>
    %132 = arith.mulf %130, %131 : vector<2x32xf32>
    %133 = vector.shape_cast %132 : vector<2x32xf32> to vector<2x1x32xf32>
    "tpu.trace_start"() <{level = 10 : i32, message = "bqd,bsd->bqs"}> : () -> ()
    %cst_67 = arith.constant dense<0.000000e+00> : vector<2x1x8xf32>
    %134 = tpu.matmul %133, %0, %cst_67 {dimension_numbers = #tpu.dot_dimension_numbers<[2], [2], [1], [1], [0, 0, 0, 1, 1, 1], [0], [0]>} : vector<2x1x32xf32>, vector<2x8x32xf32>, vector<2x1x8xf32> -> vector<2x1x8xf32>
    "tpu.trace_stop"() : () -> ()
    %135 = vector.broadcast %11 : f32 to vector<2x1x8xf32>
    %136 = arith.addf %134, %135 : vector<2x1x8xf32>
    %cst_68 = arith.constant dense<0xFF800000> : vector<2x1xf32>
    %137 = vector.multi_reduction <maximumf>, %136, %cst_68 [2] : vector<2x1x8xf32> to vector<2x1xf32>
    %138 = vector.shape_cast %137 : vector<2x1xf32> to vector<2x1x1xf32>
    %139 = vector.broadcast %138 : vector<2x1x1xf32> to vector<2x1x8xf32>
    %140 = arith.subf %136, %139 : vector<2x1x8xf32>
    %141 = math.exp %140 : vector<2x1x8xf32>
    %cst_69 = arith.constant dense<0.000000e+00> : vector<2x1xf32>
    %142 = vector.multi_reduction <add>, %141, %cst_69 [2] : vector<2x1x8xf32> to vector<2x1xf32>
    %143 = vector.shape_cast %142 : vector<2x1xf32> to vector<2x1x1xf32>
    %144 = vector.broadcast %143 : vector<2x1x1xf32> to vector<2x1x8xf32>
    %145 = arith.divf %141, %144 : vector<2x1x8xf32>
    "tpu.trace_start"() <{level = 10 : i32, message = "bqs,bsd->bqd"}> : () -> ()
    %cst_70 = arith.constant dense<0.000000e+00> : vector<2x1x32xf32>
    %146 = tpu.matmul %145, %0, %cst_70 {dimension_numbers = #tpu.dot_dimension_numbers<[2], [1], [1], [2], [0, 0, 0, 1, 1, 2], [0], [0]>} : vector<2x1x8xf32>, vector<2x8x32xf32>, vector<2x1x32xf32> -> vector<2x1x32xf32>
    "tpu.trace_stop"() : () -> ()
    %147 = vector.shape_cast %146 : vector<2x1x32xf32> to vector<2x32xf32>
    %cst_71 = arith.constant dense<0.000000e+00> : vector<2x32xf32>
    %148 = tpu.matmul %126, %4, %cst_71 {dimension_numbers = #tpu.dot_dimension_numbers<[1], [0], [0], [1], [0, 0, 1, 1], [], []>} : vector<2x32xf32>, vector<32x32xf32>, vector<2x32xf32> -> vector<2x32xf32>
    %149 = vector.broadcast %5 : vector<1x32xf32> to vector<2x32xf32>
    %150 = arith.addf %148, %149 : vector<2x32xf32>
    %151 = vector.shape_cast %150 : vector<2x32xf32> to vector<2x1x32xf32>
    %152 = vector.broadcast %151 : vector<2x1x32xf32> to vector<2x16x32xf32>
    %153 = arith.mulf %152, %1 : vector<2x16x32xf32>
    %154 = vector.shape_cast %153 : vector<2x16x32xf32> to vector<32x32xf32>
    %cst_72 = arith.constant dense<0.000000e+00> : vector<32x32xf32>
    %155 = tpu.matmul %154, %6, %cst_72 {dimension_numbers = #tpu.dot_dimension_numbers<[1], [0], [0], [1], [0, 0, 1, 1], [], []>} : vector<32x32xf32>, vector<32x32xf32>, vector<32x32xf32> -> vector<32x32xf32>
    %156 = arith.addf %155, %18 : vector<32x32xf32>
    %157 = vector.shape_cast %156 : vector<32x32xf32> to vector<2x16x32xf32>
    %158 = vector.broadcast %7 : vector<1x32xf32> to vector<2x32xf32>
    %159 = arith.mulf %147, %158 : vector<2x32xf32>
    %160 = vector.shape_cast %159 : vector<2x32xf32> to vector<2x1x32xf32>
    "tpu.trace_start"() <{level = 10 : i32, message = "bqd,bkd->bqk"}> : () -> ()
    %cst_73 = arith.constant dense<0.000000e+00> : vector<2x1x16xf32>
    %161 = tpu.matmul %160, %157, %cst_73 {dimension_numbers = #tpu.dot_dimension_numbers<[2], [2], [1], [1], [0, 0, 0, 1, 1, 1], [0], [0]>} : vector<2x1x32xf32>, vector<2x16x32xf32>, vector<2x1x16xf32> -> vector<2x1x16xf32>
    "tpu.trace_stop"() : () -> ()
    %162 = vector.broadcast %12 : f32 to vector<2x1x16xf32>
    %163 = arith.addf %161, %162 : vector<2x1x16xf32>
    %cst_74 = arith.constant dense<0xFF800000> : vector<2x1xf32>
    %164 = vector.multi_reduction <maximumf>, %163, %cst_74 [2] : vector<2x1x16xf32> to vector<2x1xf32>
    %165 = vector.shape_cast %164 : vector<2x1xf32> to vector<2x1x1xf32>
    %166 = vector.broadcast %165 : vector<2x1x1xf32> to vector<2x1x16xf32>
    %167 = arith.subf %163, %166 : vector<2x1x16xf32>
    %168 = math.exp %167 : vector<2x1x16xf32>
    %cst_75 = arith.constant dense<0.000000e+00> : vector<2x1xf32>
    %169 = vector.multi_reduction <add>, %168, %cst_75 [2] : vector<2x1x16xf32> to vector<2x1xf32>
    %170 = vector.shape_cast %169 : vector<2x1xf32> to vector<2x1x1xf32>
    %171 = vector.broadcast %170 : vector<2x1x1xf32> to vector<2x1x16xf32>
    %172 = arith.divf %168, %171 : vector<2x1x16xf32>
    "tpu.trace_start"() <{level = 10 : i32, message = "bqk,bkd->bqd"}> : () -> ()
    %cst_76 = arith.constant dense<0.000000e+00> : vector<2x1x32xf32>
    %173 = tpu.matmul %172, %1, %cst_76 {dimension_numbers = #tpu.dot_dimension_numbers<[2], [1], [1], [2], [0, 0, 0, 1, 1, 2], [0], [0]>} : vector<2x1x16xf32>, vector<2x16x32xf32>, vector<2x1x32xf32> -> vector<2x1x32xf32>
    "tpu.trace_stop"() : () -> ()
    %174 = vector.shape_cast %173 : vector<2x1x32xf32> to vector<2x32xf32>
    %cst_77 = arith.constant dense<0.000000e+00> : vector<2x32xf32>
    %175 = tpu.matmul %174, %8, %cst_77 {dimension_numbers = #tpu.dot_dimension_numbers<[1], [0], [0], [1], [0, 0, 1, 1], [], []>} : vector<2x32xf32>, vector<32x32xf32>, vector<2x32xf32> -> vector<2x32xf32>
    %cst_78 = arith.constant dense<0.000000e+00> : vector<2x32xf32>
    %176 = tpu.matmul %126, %9, %cst_78 {dimension_numbers = #tpu.dot_dimension_numbers<[1], [0], [0], [1], [0, 0, 1, 1], [], []>} : vector<2x32xf32>, vector<32x32xf32>, vector<2x32xf32> -> vector<2x32xf32>
    %177 = arith.addf %175, %176 : vector<2x32xf32>
    %178 = vector.broadcast %10 : vector<1x32xf32> to vector<2x32xf32>
    %179 = arith.addf %177, %178 : vector<2x32xf32>
    %c0_79 = arith.constant 0 : index
    %c0_80 = arith.constant 0 : index
    %180 = vector.load %arg17[%c0_79, %c0_80] : memref<2x32xf32, #tpu.memory_space<vmem>>, vector<2x32xf32>
    tpu.vector_store %arg17[%c0_79, %c0_80], %179 {strides = array<i32>} : memref<2x32xf32, #tpu.memory_space<vmem>>, vector<2x32xf32>,
    return
  }
  func.func @transform_0(%arg0: i32) -> (i32, i32, i32) {
    %c0_i32 = arith.constant 0 : i32
    %c0_i32_0 = arith.constant 0 : i32
    %c0_i32_1 = arith.constant 0 : i32
    return %arg0, %c0_i32, %c0_i32_0 : i32, i32, i32
  }
  func.func @transform_1(%arg0: i32) -> (i32, i32, i32) {
    %c0_i32 = arith.constant 0 : i32
    %c0_i32_0 = arith.constant 0 : i32
    %c0_i32_1 = arith.constant 0 : i32
    return %c0_i32, %arg0, %c0_i32_0 : i32, i32, i32
  }
  func.func @transform_2(%arg0: i32) -> (i32, i32, i32) {
    %c0_i32 = arith.constant 0 : i32
    %c0_i32_0 = arith.constant 0 : i32
    %c0_i32_1 = arith.constant 0 : i32
    return %arg0, %c0_i32, %c0_i32_0 : i32, i32, i32
  }
  func.func @transform_3(%arg0: i32) -> (i32, i32) {
    %c0_i32 = arith.constant 0 : i32
    %c0_i32_0 = arith.constant 0 : i32
    %c0_i32_1 = arith.constant 0 : i32
    return %c0_i32, %c0_i32_0 : i32, i32
  }
  func.func @transform_4(%arg0: i32) -> (i32, i32) {
    %c0_i32 = arith.constant 0 : i32
    %c0_i32_0 = arith.constant 0 : i32
    %c0_i32_1 = arith.constant 0 : i32
    return %c0_i32, %c0_i32_0 : i32, i32
  }
  func.func @transform_5(%arg0: i32) -> (i32, i32) {
    %c0_i32 = arith.constant 0 : i32
    %c0_i32_0 = arith.constant 0 : i32
    %c0_i32_1 = arith.constant 0 : i32
    return %c0_i32, %c0_i32_0 : i32, i32
  }
  func.func @transform_6(%arg0: i32) -> (i32, i32) {
    %c0_i32 = arith.constant 0 : i32
    %c0_i32_0 = arith.constant 0 : i32
    %c0_i32_1 = arith.constant 0 : i32
    return %c0_i32, %c0_i32_0 : i32, i32
  }
  func.func @transform_7(%arg0: i32) -> (i32, i32) {
    %c0_i32 = arith.constant 0 : i32
    %c0_i32_0 = arith.constant 0 : i32
    %c0_i32_1 = arith.constant 0 : i32
    return %c0_i32, %c0_i32_0 : i32, i32
  }
  func.func @transform_8(%arg0: i32) -> (i32, i32) {
    %c0_i32 = arith.constant 0 : i32
    %c0_i32_0 = arith.constant 0 : i32
    %c0_i32_1 = arith.constant 0 : i32
    return %c0_i32, %c0_i32_0 : i32, i32
  }
  func.func @transform_9(%arg0: i32) -> (i32, i32) {
    %c0_i32 = arith.constant 0 : i32
    %c0_i32_0 = arith.constant 0 : i32
    %c0_i32_1 = arith.constant 0 : i32
    return %c0_i32, %c0_i32_0 : i32, i32
  }
  func.func @transform_10(%arg0: i32) -> (i32, i32) {
    %c0_i32 = arith.constant 0 : i32
    %c0_i32_0 = arith.constant 0 : i32
    %c0_i32_1 = arith.constant 0 : i32
    return %c0_i32, %c0_i32_0 : i32, i32
  }
  func.func @transform_11(%arg0: i32) -> (i32, i32) {
    %c0_i32 = arith.constant 0 : i32
    %c0_i32_0 = arith.constant 0 : i32
    %c0_i32_1 = arith.constant 0 : i32
    return %c0_i32, %c0_i32_0 : i32, i32
  }
  func.func @transform_12(%arg0: i32) -> (i32, i32) {
    %c0_i32 = arith.constant 0 : i32
    %c0_i32_0 = arith.constant 0 : i32
    %c0_i32_1 = arith.constant 0 : i32
    return %c0_i32, %c0_i32_0 : i32, i32
  }
  func.func @transform_13(%arg0: i32) -> (i32, i32) {
    %c0_i32 = arith.constant 0 : i32
    %c0_i32_0 = arith.constant 0 : i32
    %c0_i32_1 = arith.constant 0 : i32
    return %c0_i32, %c0_i32_0 : i32, i32
  }
  func.func @transform_14(%arg0: i32) -> (i32, i32) {
    %c0_i32 = arith.constant 0 : i32
    %c0_i32_0 = arith.constant 0 : i32
    %c0_i32_1 = arith.constant 0 : i32
    return %c0_i32, %c0_i32_0 : i32, i32
  }
  func.func @transform_15(%arg0: i32) -> (i32, i32) {
    %c0_i32 = arith.constant 0 : i32
    %c0_i32_0 = arith.constant 0 : i32
    %c0_i32_1 = arith.constant 0 : i32
    return %c0_i32, %c0_i32_0 : i32, i32
  }
  func.func @transform_16(%arg0: i32) -> (i32, i32) {
    %c0_i32 = arith.constant 0 : i32
    %c0_i32_0 = arith.constant 0 : i32
    return %arg0, %c0_i32 : i32, i32
  }
}

</mosaic_0001>

<bundles_post_ra>
// kernel: tpu_custom_call.1
= control target key start
LH: loop header
LB: loop body
LE: loop exit
PB: predicated region body
PF: predicated region fallthrough
CT: control target
= control target key end

     0   :  { %s5338_s0 = inlined_call_operand.hbm [shape: f32[2,8,32], index: 0, kind: input, shape index: {}]   ;;  %s5339_s1 = inlined_call_operand.hbm [shape: f32[3,2,32], index: 1, kind: input, shape index: {}]   ;;  %s5340_s2 = inlined_call_operand.hbm [shape: f32[2,16,32], index: 2, kind: input, shape index: {}]   ;;  %s5341_s3 = inlined_call_operand.hbm [shape: f32[32,32], index: 3, kind: input, shape index: {}]   ;;  %s5342_s4 = inlined_call_operand.vmem [shape: f32[1,32], index: 4, kind: input, shape index: {}]   ;;  %s5343_s5 = inlined_call_operand.<no memory space> [shape: f32[1,1], index: 5, kind: input, shape index: {}]   ;;  %s5344_s6 = inlined_call_operand.hbm [shape: f32[32,32], index: 6, kind: input, shape index: {}]   ;;  %s5345_s7 = inlined_call_operand.vmem [shape: f32[1,32], index: 7, kind: input, shape index: {}]   ;;  %s5346_s8 = inlined_call_operand.vmem [shape: f32[32,32], index: 8, kind: input, shape index: {}]   ;;  %s5347_s9 = inlined_call_operand.hbm [shape: f32[32,32], index: 9, kind: input, shape index: {}]   ;;  %s5348_s10 = inlined_call_operand.vmem [shape: f32[1,32], index: 10, kind: input, shape index: {}]   ;;  %s5349_s11 = inlined_call_operand.vmem [shape: f32[1,32], index: 11, kind: input, shape index: {}]   ;;  %s5350_s12 = inlined_call_operand.<no memory space> [shape: f32[1,1], index: 12, kind: input, shape index: {}]   ;;  %s5351_s13 = inlined_call_operand.hbm [shape: f32[32,32], index: 13, kind: input, shape index: {}]   ;;  %s5352_s14 = inlined_call_operand.hbm [shape: f32[32,32], index: 14, kind: input, shape index: {}]   ;;  %s5353_s15 = inlined_call_operand.vmem [shape: f32[1,32], index: 15, kind: input, shape index: {}]   ;;  %s5354_s16 = inlined_call_operand.hbm [shape: f32[2,32], index: 16, kind: output, shape index: {}]  }
   0x1   :  { %5357 = sst [smem:[#allocation25_spill]] %s5338_s0 }
   0x2   :  { %5358 = sst [smem:[#allocation26_spill]] %s5354_s16 }
   0x3   :  { %23 = vsyncpa [#allocation5], 0 }
   0x4   :  { %24 = vsyncpa [#allocation8], 0 }
   0x5   :  { %25 = vsyncpa [#allocation11], 0 }
   0x6   :  { %26 = vsyncpa [#allocation14], 0 }
   0x7   :  { %27 = vsyncpa [#allocation17], 0 }
   0x8   :  { %28 = vsyncpa [#allocation6], 0  ;;  %s4622_s21 = smov [#allocation7]   ;;  %s4412_s25 = scalar_lea.hbm %s5339_s1, 96 }
   0x9   :  { %s46_s22 = sshll.u32 %s4622_s21, 4  ;;  %p4413_p0 = scmp.ne.s32.totalorder %s5339_s1, %s4412_s25  ;;  %s47_s22 = int_to_ptr.vmem [resolvable:$true] %s46_s22 }
   0xa   :  { %p4416_p1 = scmp.lt.u32.totalorder %s4412_s25, %s5339_s1 }
   0xc   :  { %p4418_p2 = pnand %p4416_p1, %p4413_p0 }
   0xe   :  { %4421 = shalt.err (!%p4418_p2)
}
   0xf   :  { %s4422_s30 = scalar_lea.vmem %s47_s22, 96  ;;  %p4427_p4 = scmp.lt.s32.totalorder %s47_s22, %s47_s22 }
  0x10   :  { %p4423_p3 = scmp.ne.s32.totalorder %s47_s22, %s4422_s30  ;;  %p4428_p5 = scmp.lt.s32.totalorder %s4422_s30, %s4422_s30 }
  0x12   :  { %p4429_p6 = por %p4428_p5, %p4427_p4 }
  0x14   :  { %p4430_p7 = pnand %p4429_p6, %p4423_p3 }
  0x16   :  { %4433 = shalt.err (!%p4430_p7)
}
  0x17   :  { %s4623_s0 = smov 32   ;;  %s4624_s17 = smov 2  }
  0x18   :  { %52 = dma.hbm_to_vmem [thread:$0]  %s5339_s1, 96, %s47_s22, [#allocation8], %s4623_s0, %s4623_s0, %s4624_s17  }
  0x19   :  { %s4625_s20 = smov [#allocation10]   ;;  %s4626_s23 = smov [#allocation13]  }
  0x1a   :  { %s70_s21 = sshll.u32 %s4625_s20, 4  ;;  %s102_s24 = sshll.u32 %s4626_s23, 4  ;;  %s71_s21 = int_to_ptr.vmem [resolvable:$true] %s70_s21  ;;  %s103_s24 = int_to_ptr.vmem [resolvable:$true] %s102_s24 }
  0x1b   :  { %s4434_s27 = scalar_lea.hbm %s5341_s3, 512 }
  0x1c   :  { %p4435_p8 = scmp.ne.s32.totalorder %s5341_s3, %s4434_s27  ;;  %p4438_p9 = scmp.lt.u32.totalorder %s4434_s27, %s5341_s3 }
  0x1e   :  { %p4440_p10 = pnand %p4438_p9, %p4435_p8 }
  0x20   :  { %4443 = shalt.err (!%p4440_p10)
}
  0x21   :  { %s4444_s1 = scalar_lea.vmem %s71_s21, 512  ;;  %p4449_p12 = scmp.lt.s32.totalorder %s71_s21, %s71_s21 }
  0x22   :  { %p4445_p11 = scmp.ne.s32.totalorder %s71_s21, %s4444_s1  ;;  %p4450_p13 = scmp.lt.s32.totalorder %s4444_s1, %s4444_s1 }
  0x24   :  { %p4451_p0 = por %p4450_p13, %p4449_p12 }
  0x26   :  { %p4452_p1 = pnand %p4451_p0, %p4445_p11 }
  0x28   :  { %4455 = shalt.err (!%p4452_p1)
}
  0x29   :  { %s4627_s22 = smov 128   ;;  %s4628_s0 = smov 8  }
  0x2a   :  { %76 = dma.hbm_to_vmem [thread:$0]  %s5341_s3, 512, %s71_s21, [#allocation11], %s4627_s22, %s4627_s22, %s4628_s0  }
  0x2b   :  { %s4456_s20 = scalar_lea.hbm %s5347_s9, 512 }
  0x2c   :  { %p4457_p2 = scmp.ne.s32.totalorder %s5347_s9, %s4456_s20  ;;  %p4460_p3 = scmp.lt.u32.totalorder %s4456_s20, %s5347_s9 }
  0x2e   :  { %p4462_p4 = pnand %p4460_p3, %p4457_p2 }
  0x30   :  { %4465 = shalt.err (!%p4462_p4)
}
  0x31   :  { %s4466_s28 = scalar_lea.vmem %s103_s24, 512  ;;  %p4471_p6 = scmp.lt.s32.totalorder %s103_s24, %s103_s24 }
  0x32   :  { %p4467_p5 = scmp.ne.s32.totalorder %s103_s24, %s4466_s28  ;;  %p4472_p7 = scmp.lt.s32.totalorder %s4466_s28, %s4466_s28 }
  0x34   :  { %p4473_p8 = por %p4472_p7, %p4471_p6 }
  0x36   :  { %p4474_p9 = pnand %p4473_p8, %p4467_p5 }
  0x38   :  { %4477 = shalt.err (!%p4474_p9)
}
  0x39   :  { %108 = dma.hbm_to_vmem [thread:$0]  %s5347_s9, 512, %s103_s24, [#allocation14], %s4627_s22, %s4627_s22, %s4628_s0  }
  0x3a   :  { %s4629_s29 = smov [#allocation4]   ;;  %s4630_s1 = smov [#allocation9]  }
  0x3b   :  { %s34_s30 = sshll.u32 %s4629_s29, 4  ;;  %s58_s17 = sshll.u32 %s4630_s1, 4  ;;  %s35_s30 = int_to_ptr.vmem [resolvable:$true] %s34_s30  ;;  %s59_s17 = int_to_ptr.vmem [resolvable:$true] %s58_s17 }
  0x3c   :  { %s5359_s19 = sld [smem:[#allocation25_spill]] }
  0x42   :  { %s4478_s20 = scalar_lea.hbm %s5359_s19, 256 }
  0x43   :  { %p4479_p10 = scmp.ne.s32.totalorder %s5359_s19, %s4478_s20  ;;  %p4482_p11 = scmp.lt.u32.totalorder %s4478_s20, %s5359_s19 }
  0x45   :  { %p4484_p12 = pnand %p4482_p11, %p4479_p10 }
  0x47   :  { %4487 = shalt.err (!%p4484_p12)
}
  0x48   :  { %s4488_s9 = scalar_lea.vmem %s35_s30, 256  ;;  %p4493_p0 = scmp.lt.s32.totalorder %s35_s30, %s35_s30 }
  0x49   :  { %p4489_p13 = scmp.ne.s32.totalorder %s35_s30, %s4488_s9  ;;  %p4494_p1 = scmp.lt.s32.totalorder %s4488_s9, %s4488_s9 }
  0x4b   :  { %p4495_p2 = por %p4494_p1, %p4493_p0 }
  0x4d   :  { %p4496_p3 = pnand %p4495_p2, %p4489_p13 }
  0x4f   :  { %4499 = shalt.err (!%p4496_p3)
}
  0x50   :  { %40 = dma.hbm_to_vmem [thread:$0]  %s5359_s19, 256, %s35_s30, [#allocation5], %s4627_s22, %s4627_s22, %s4628_s0  }
  0x51   :  { %s4500_s29 = scalar_lea.hbm %s5340_s2, 512 }
  0x52   :  { %p4501_p4 = scmp.ne.s32.totalorder %s5340_s2, %s4500_s29  ;;  %p4504_p5 = scmp.lt.u32.totalorder %s4500_s29, %s5340_s2 }
  0x54   :  { %p4506_p6 = pnand %p4504_p5, %p4501_p4 }
  0x56   :  { %4509 = shalt.err (!%p4506_p6)
}
  0x57   :  { %s4510_s23 = scalar_lea.vmem %s59_s17, 512  ;;  %p4515_p8 = scmp.lt.s32.totalorder %s59_s17, %s59_s17 }
  0x58   :  { %p4511_p7 = scmp.ne.s32.totalorder %s59_s17, %s4510_s23  ;;  %p4516_p9 = scmp.lt.s32.totalorder %s4510_s23, %s4510_s23 }
  0x5a   :  { %p4517_p10 = por %p4516_p9, %p4515_p8 }
  0x5c   :  { %p4518_p11 = pnand %p4517_p10, %p4511_p7 }
  0x5e   :  { %4521 = shalt.err (!%p4518_p11)
}
  0x5f   :  { %64 = dma.hbm_to_vmem [thread:$0]  %s5340_s2, 512, %s59_s17, [#allocation8], %s4627_s22, %s4627_s22, %s4628_s0  }
  0x60   :  { %s4631_s25 = smov [#allocation12]   ;;  %s4632_s27 = smov [#allocation15]  }
  0x61   :  { %s86_s26 = sshll.u32 %s4631_s25, 4  ;;  %s120_s9 = sshll.u32 %s4632_s27, 4  ;;  %s87_s26 = int_to_ptr.vmem [resolvable:$true] %s86_s26  ;;  %s121_s9 = int_to_ptr.vmem [resolvable:$true] %s120_s9 }
  0x62   :  { %s4522_s3 = scalar_lea.hbm %s5344_s6, 512 }
  0x63   :  { %p4523_p12 = scmp.ne.s32.totalorder %s5344_s6, %s4522_s3  ;;  %p4526_p13 = scmp.lt.u32.totalorder %s4522_s3, %s5344_s6 }
  0x65   :  { %p4528_p0 = pnand %p4526_p13, %p4523_p12 }
  0x67   :  { %4531 = shalt.err (!%p4528_p0)
}
  0x68   :  { %s4532_s2 = scalar_lea.vmem %s87_s26, 512  ;;  %p4537_p2 = scmp.lt.s32.totalorder %s87_s26, %s87_s26 }
  0x69   :  { %p4533_p1 = scmp.ne.s32.totalorder %s87_s26, %s4532_s2  ;;  %p4538_p3 = scmp.lt.s32.totalorder %s4532_s2, %s4532_s2 }
  0x6b   :  { %p4539_p4 = por %p4538_p3, %p4537_p2 }
  0x6d   :  { %p4540_p5 = pnand %p4539_p4, %p4533_p1 }
  0x6f   :  { %4543 = shalt.err (!%p4540_p5)
}
  0x70   :  { %92 = dma.hbm_to_vmem [thread:$0]  %s5344_s6, 512, %s87_s26, [#allocation11], %s4627_s22, %s4627_s22, %s4628_s0  }
  0x71   :  { %s4544_s30 = scalar_lea.hbm %s5351_s13, 512 }
  0x72   :  { %p4545_p6 = scmp.ne.s32.totalorder %s5351_s13, %s4544_s30  ;;  %p4548_p7 = scmp.lt.u32.totalorder %s4544_s30, %s5351_s13 }
  0x74   :  { %p4550_p8 = pnand %p4548_p7, %p4545_p6 }
  0x76   :  { %4553 = shalt.err (!%p4550_p8)
}
  0x77   :  { %s4554_s28 = scalar_lea.vmem %s121_s9, 512  ;;  %p4559_p10 = scmp.lt.s32.totalorder %s121_s9, %s121_s9 }
  0x78   :  { %p4555_p9 = scmp.ne.s32.totalorder %s121_s9, %s4554_s28  ;;  %p4560_p11 = scmp.lt.s32.totalorder %s4554_s28, %s4554_s28 }
  0x7a   :  { %p4561_p12 = por %p4560_p11, %p4559_p10 }
  0x7c   :  { %p4562_p13 = pnand %p4561_p12, %p4555_p9 }
  0x7e   :  { %4565 = shalt.err (!%p4562_p13)
}
  0x7f   :  { %126 = dma.hbm_to_vmem [thread:$0]  %s5351_s13, 512, %s121_s9, [#allocation14], %s4627_s22, %s4627_s22, %s4628_s0  }
  0x80   :  { %s4633_s3 = smov [#allocation16]   ;;  %s4566_s18 = scalar_lea.hbm %s5352_s14, 512 }
  0x81   :  { %s132_s21 = sshll.u32 %s4633_s3, 4  ;;  %p4567_p0 = scmp.ne.s32.totalorder %s5352_s14, %s4566_s18  ;;  %s133_s21 = int_to_ptr.vmem [resolvable:$true] %s132_s21 }
  0x82   :  { %p4570_p1 = scmp.lt.u32.totalorder %s4566_s18, %s5352_s14 }
  0x84   :  { %p4572_p2 = pnand %p4570_p1, %p4567_p0 }
  0x86   :  { %4575 = shalt.err (!%p4572_p2)
}
  0x87   :  { %s4576_s23 = scalar_lea.vmem %s133_s21, 512  ;;  %p4581_p4 = scmp.lt.s32.totalorder %s133_s21, %s133_s21 }
  0x88   :  { %p4577_p3 = scmp.ne.s32.totalorder %s133_s21, %s4576_s23  ;;  %p4582_p5 = scmp.lt.s32.totalorder %s4576_s23, %s4576_s23 }
  0x8a   :  { %p4583_p6 = por %p4582_p5, %p4581_p4 }
  0x8c   :  { %p4584_p7 = pnand %p4583_p6, %p4577_p3 }
  0x8e   :  { %4587 = shalt.err (!%p4584_p7)
}
  0x8f   :  { %138 = dma.hbm_to_vmem [thread:$0]  %s5352_s14, 512, %s133_s21, [#allocation17], %s4627_s22, %s4627_s22, %s4628_s0  }
  0x90   :  { %4610 = dma.done.wait [#allocation5], 256  }
  0x91   :  { %4611 = vsyncadd [#allocation5], 4294967040 }
  0x92   :  { %4612 = dma.done.wait [#allocation8], 608  }
  0x93   :  { %4613 = vsyncadd [#allocation8], 4294966688 }
  0x94   :  { %4614 = dma.done.wait [#allocation11], 1024  }
  0x95   :  { %4615 = vsyncadd [#allocation11], 4294966272 }
  0x96   :  { %4616 = dma.done.wait [#allocation14], 1024  }
  0x97   :  { %4617 = vsyncadd [#allocation14], 4294966272 }
  0x98   :  { %4618 = dma.done.wait [#allocation17], 512  }
  0x99   :  { %4619 = vsyncadd [#allocation17], 4294966784  ;;  %v4634_v0 = vmov 0.0|0.0   ;;  %vm4635_vm0 = vmmov 0   ;;  %v4636_v1 = vmov 0.0   ;;  %v171_v2 = vld [vmem:[#allocation10] sm:$0xff]  ;;  %v391_v22 = vlaneseq }
  0x9a   :  { %4209 = vmatprep.subr.bf16.mxu1 %v4634_v0  ;;  %3891 = vmatprep.mubr.msk.f32.mxu1 %vm4635_vm0, %v4636_v1  ;;  %v172_v3 = vld [vmem:[#allocation10 + $0x8] sm:$0xff]  ;;  %v173_v4 = vld [vmem:[#allocation10 + $0x10] sm:$0xff]  ;;  %v174_v6 = vld [vmem:[#allocation10 + $0x18] sm:$0xff]  ;;  %vm208_vm1 = vcmask 261120   ;;  %v4637_v20 = vmov 1966171168   ;;  %v4918_v40 = vstv %s5343_s5 }
  0x9b   :  { %v4844_v5 = vpack.c.bf16 %v172_v3, %v171_v2  ;;  %v197_v7 = vld [vmem:[#allocation13] sm:$0xff]  ;;  %v198_v8 = vld [vmem:[#allocation13 + $0x8] sm:$0xff]  ;;  %v199_v10 = vld [vmem:[#allocation13 + $0x10] sm:$0xff]  ;;  %v4847_v12 = vpack.c.bf16 %v174_v6, %v173_v4  ;;  %v389_v21 = vunpack.c.l.s4 %v4637_v20  ;;  %v4884_v24 = vshrl.u32 %v391_v22, 7 }
  0x9c   :  { %v4201_v9 = vpack.c.bf16 %v198_v8, %v197_v7  ;;  %v200_v11 = vld [vmem:[#allocation13 + $0x18] sm:$0xff]  ;;  %v4856_v14 = vld [vmem:[#allocation9] sm:$0xff]  ;;  %v4860_v15 = vld [vmem:[#allocation9 + $0x8] sm:$0xff]  ;;  %vm561_vm2 = vcmask 57344   ;;  %vm584_vm3 = vcmask 64512   ;;  %vm1351_vm4 = vcmask 1041409  }
  0x9d   :  { %4211 = vmatpush3.bf16.msra.mxu1 %v4844_v5  ;;  %v4205_v13 = vpack.c.bf16 %v200_v11, %v199_v10  ;;  %3877 = vmatprep.mubr.msk.f32.mxu0 %vm208_vm1, %v4856_v14  ;;  %v4864_v16 = vld [vmem:[#allocation9 + $0x10] sm:$0xff]  ;;  %v4872_v18 = vld [vmem:[#allocation9 + $0x18] sm:$0xff]  ;;  %v390_v23 = vunpack.c.0.s8 %v389_v21  ;;  %v4889_v26 = vld [vmem:[%s5342_s4] ss:$0 sm:$0xff]  ;;  %vm1108_vm6 = vcmask 122880   ;;  %vm1131_vm7 = vcmask 130048  }
  0x9e   :  { %4212 = vmatprep.subr.bf16.mxu1 %v4634_v0  ;;  %4202 = vmatprep.subr.bf16.mxu0 %v4201_v9  ;;  %v4866_v17 = vld [vmem:[#allocation4] sm:$0xff]  ;;  %v4876_v19 = vld [vmem:[#allocation4 + $0x8] sm:$0xff]  ;;  %v306_v25 = vld [vmem:[#allocation7] sm:$0x3]  ;;  %vm3624_vm8 = vcmask 254976  }
  0x9f   :  { %4204 = vmatpush3.bf16.msra.mxu0 %v4201_v9  ;;  %v4892_v29 = vsub.s32 %v390_v23, %v4884_v24  ;;  %v176_v61 = vld [vmem:[#allocation12] sm:$0xff]  ;;  %v177_v62 = vld [vmem:[#allocation12 + $0x8] sm:$0xff]  ;;  %v178_v4 = vld [vmem:[#allocation12 + $0x10] sm:$0xff] }
  0xa0   :  { %4206 = vmatprep.subr.bf16.mxu0 %v4205_v13  ;;  %v4926_v2 = vpack.c.bf16 %v177_v62, %v176_v61  ;;  %v179_v6 = vld [vmem:[#allocation12 + $0x18] sm:$0xff]  ;;  %v181_v10 = vld [vmem:[%s5346_s8] sm:$0xff]  ;;  %v184_v21 = vld [vmem:[%s5346_s8 + $0x18] sm:$0xff] }
  0xa1   :  { %4214 = vmatpush3.bf16.msra.mxu1 %v4847_v12  ;;  %v4930_v9 = vpack.c.bf16 %v179_v6, %v178_v4  ;;  %v182_v11 = vld [vmem:[%s5346_s8 + $0x8] sm:$0xff]  ;;  %v183_v20 = vld [vmem:[%s5346_s8 + $0x10] sm:$0xff]  ;;  %vm5005_vm5 = vmpackc.low %vm208_vm1, %vm208_vm1  ;;  %v5036_v6 = vstv %s5350_s12 }
  0xa2   :  { %3894 = vmatprep.subr.mxu1 %v4636_v1  ;;  %v4957_v22 = vpack.c.bf16 %v184_v21, %v183_v20 }
  0xa3   :  { %4208 = vmatpush3.bf16.msra.mxu0 %v4205_v13  ;;  %v4947_v13 = vpack.c.bf16 %v182_v11, %v181_v10 }
  0xa4   :  { %3892 = vmatmul.mubr.f32.vlgmr.msra.gmra.mrb[0].mxu1 %v4636_v1  ;;  %3899 = vmatprep.subr.mxu0 %v4636_v1 }
  0xa5   :  { %3896 = vmatprep.mubr.msk.f32.mxu1 %vm4635_vm0, %v4636_v1 }
  0xa6   :  { %3878 = vmatmul.mubr.msk.f32.vlgmr.msra.gmra.mrb[0].mxu0 %vm208_vm1, %v4860_v15 }
  0xa7   :  { %3880 = vmatprep.mubr.msk.f32.mxu0 %vm208_vm1, %v4864_v16 }
  0xaa   :  { %3895 = vmatpush3.xpose.msk.msra.mxu1 %vm208_vm1, %v4866_v17  ;;  %3881 = vmatmul.mubr.msk.f32.gmra.mrb[2].mxu0 %vm208_vm1, %v4872_v18 }
  0xab   :  { %3904 = vmatprep.subr.mxu1 %v4636_v1  ;;  %3901 = vmatprep.mubr.msk.f32.mxu0 %vm4635_vm0, %v4636_v1 }
  0xac   :  { %3900 = vmatpush3.xpose.msk.msra.mxu0 %vm208_vm1, %v4876_v19 }
  0xad   :  { %3909 = vmatprep.subr.mxu0 %v4636_v1 }
 0x177   :  { %v376_v27 = vpop.f32.mrb[0].mxu1 }
 0x178   :  { %v377_v28 = vadd.f32 %v376_v27, %v306_v25  ;;  %v3893_v30 = vpop.f32.mrb[1].mxu1 }
 0x179   :  { %v4907_v36 = vpop.f32.mrb[0].mxu0 }
 0x17a   :  { %v386_v31 = vmul.f32 %v4889_v26, %v377_v28  ;;  %v4909_v37 = vpop.f32.mrb[1].mxu0 }
 0x17c   :  { %v394_v32 = vrot.slane %v386_v31, %v4892_v29 }
 0x17d   :  { %v4911_v38 = vpop.f32.mrb[2].mxu0 }
 0x17e   :  { %v395_v33 = vcombine.high %v394_v32, %v394_v32  ;;  %v402_v34 = vrot.slane %v394_v32, %v4892_v29  ;;  %v4913_v39 = vpop.f32.mrb[3].mxu0  ;;  %v4968_v32 = vld [vmem:[%s5345_s7] ss:$0 sm:$0xff] }
 0x180   :  { %v409_v35 = vrot.slane %v395_v33, %v4892_v29  ;;  %3897 = vmatmul.mubr.msk.f32.vlgmr.msra.gmra.mrb[2].mxu1 %vm208_vm1, %v402_v34 }
 0x181   :  { %3905 = vmatpush3.msra.mxu1 %v4866_v17  ;;  %3906 = vmatprep.mubr.msk.f32.mxu1 %vm4635_vm0, %v4636_v1 }
 0x182   :  { %3902 = vmatmul.mubr.msk.f32.vlgmr.msra.gmra.mrb[4].mxu0 %vm208_vm1, %v409_v35  ;;  %4215 = vmatprep.subr.bf16.mxu1 %v4634_v0 }
 0x183   :  { %3910 = vmatpush3.msra.mxu0 %v4876_v19  ;;  %3911 = vmatprep.mubr.msk.f32.mxu0 %vm4635_vm0, %v4636_v1 }
 0x184   :  { %4222 = vmatprep.subr.bf16.mxu0 %v4947_v13 }
 0x253   :  { %v482_v41 = vpop.f32.mrb[2].mxu1 }
 0x254   :  { %v483_v42 = vadd.f32 %v482_v41, %v4918_v40  ;;  %v3898_v43 = vpop.f32.mrb[3].mxu1 }
 0x255   :  { %v557_v44 = vpop.f32.mrb[4].mxu0 }
 0x256   :  { %v558_v45 = vadd.f32 %v557_v44, %v4918_v40  ;;  %v3903_v46 = vpop.f32.mrb[5].mxu0  ;;  %v562_v47 = vsel %vm561_vm2, %v483_v42, -inf }
 0x257   :  { %563 = vmax.xlane.f32.xlu0 %v562_v47 }
 0x258   :  { %v565_v48 = vsel %vm561_vm2, %v558_v45, -inf }
 0x259   :  { %566 = vmax.xlane.f32.xlu1 %v565_v48 }
 0x2e4   :  { %v564_v49 = vpop.xlane.xlu0 %563 }
 0x2e5   :  { %v568_v50 = vsub.f32 %v483_v42, %v564_v49  ;;  %v4973_v42 = vsub.s32 0, %v4884_v24 }
 0x2e6   :  { %v567_v51 = vpop.xlane.xlu1 %566 }
 0x2e7   :  { %v570_v52 = vmul.f32 1.442695, %v568_v50  ;;  %v569_v53 = vsub.f32 %v558_v45, %v567_v51  ;;  %v3645_v51 = vld [vmem:[%s5348_s10] ss:$0 sm:$0xff] }
 0x2e9   :  { %4364 = vpow2.f32 %v570_v52  ;;  %v572_v54 = vmul.f32 1.442695, %v569_v53  ;;  %v4993_v52 = vadd.f32 %v4907_v36, %v3645_v51  ;;  %v4996_v53 = vadd.f32 %v3645_v51, %v4909_v37 }
 0x2ea   :  { %v5010_v36 = vadd.f32 %v3645_v51, %v4913_v39 }
 0x2eb   :  { %4366 = vpow2.f32 %v572_v54 }
 0x2f3   :  { %v4365_v55 = vpop.eup %4364 }
 0x2f4   :  { %v574_v56 = vsel %vm561_vm2, %v4365_v55, 0.0 }
 0x2f5   :  { %v4367_v57 = vpop.eup %4366  ;;  %575 = vadd.xlane.f32.xlu0 %v574_v56 }
 0x2f6   :  { %v577_v58 = vsel %vm561_vm2, %v4367_v57, 0.0 }
 0x2f7   :  { %578 = vadd.xlane.f32.xlu1 %v577_v58  ;;  %v5001_v58 = vadd.f32 %v4911_v38, %v3645_v51  ;;  %v5020_v38 = vld [vmem:[%s5349_s11] ss:$0 sm:$0xff] }
 0x382   :  { %v576_v59 = vpop.xlane.xlu0 %575 }
 0x383   :  { %4368 = vrcp.f32 %v576_v59 }
 0x384   :  { %v579_v60 = vpop.xlane.xlu1 %578 }
 0x385   :  { %4370 = vrcp.f32 %v579_v60 }
 0x38d   :  { %v4369_v63 = vpop.eup %4368 }
 0x38e   :  { %v581_v3 = vmul.f32 %v4369_v63, %v4365_v55 }
 0x38f   :  { %v4371_v7 = vpop.eup %4370 }
 0x390   :  { %v583_v8 = vmul.f32 %v4371_v7, %v4367_v57  ;;  %3907 = vmatmul.mubr.msk.f32.vlgmr.msra.gmra.mrb[4].mxu1 %vm584_vm3, %v581_v3 }
 0x391   :  { %4217 = vmatpush3.bf16.msra.mxu1 %v4926_v2  ;;  %3922 = vmatprep.mubr.msk.f32.mxu1 %vm4635_vm0, %v4636_v1 }
 0x392   :  { %3912 = vmatmul.mubr.msk.f32.vlgmr.msra.gmra.mrb[6].mxu0 %vm584_vm3, %v583_v8  ;;  %4218 = vmatprep.subr.bf16.mxu1 %v4634_v0 }
 0x393   :  { %4224 = vmatpush3.bf16.msra.mxu0 %v4947_v13 }
 0x394   :  { %4226 = vmatprep.subr.bf16.mxu0 %v4957_v22 }
 0x395   :  { %4220 = vmatpush3.bf16.msra.mxu1 %v4930_v9 }
 0x396   :  { %4229 = vmatprep.subr.bf16.mxu1 %v4634_v0 }
 0x397   :  { %4228 = vmatpush3.bf16.msra.mxu0 %v4957_v22 }
 0x398   :  { %3923 = vmatmul.mubr.f32.vlgmr.msra.gmra.mrb[6].mxu1 %v4636_v1  ;;  %4233 = vmatprep.subr.bf16.mxu0 %v4634_v0 }
 0x399   :  { %3943 = vmatprep.mubr.msk.f32.mxu1 %vm4635_vm0, %v4636_v1 }
 0x463   :  { %v654_v23 = vpop.f32.mrb[4].mxu1 }
 0x464   :  { %v3908_v25 = vpop.f32.mrb[5].mxu1  ;;  %v947_v39 = vmul.f32 %v5020_v38, %v654_v23 }
 0x465   :  { %v727_v27 = vpop.f32.mrb[6].mxu0 }
 0x466   :  { %v1436_v28 = vrot.slane %v727_v27, 7  ;;  %v3913_v30 = vpop.f32.mrb[7].mxu0  ;;  %v948_v4 = vmul.f32 %v5020_v38, %v727_v27 }
 0x468   :  { %v4963_v31 = vsel %vm1351_vm4, %v1436_v28, %v654_v23 }
 0x46b   :  { %v803_v33 = vpop.f32.mrb[6].mxu1 }
 0x46c   :  { %v804_v34 = vadd.f32 %v4968_v32, %v803_v33  ;;  %v3924_v35 = vpop.f32.mrb[7].mxu1 }
 0x46e   :  { %v814_v41 = vrot.slane %v804_v34, %v4892_v29 }
 0x470   :  { %v815_v43 = vcombine.high %v814_v41, %v814_v41  ;;  %v822_v44 = vrot.slane %v814_v41, %v4892_v29 }
 0x472   :  { %v829_v45 = vrot.slane %v815_v43, %v4892_v29  ;;  %v833_v46 = vrot.slane %v822_v44, %v4973_v42 }
 0x474   :  { %v837_v47 = vrot.slane %v829_v45, %v4973_v42  ;;  %v841_v48 = vmul.f32 %v833_v46, %v4860_v15  ;;  %v840_v49 = vmul.f32 %v833_v46, %v4856_v14  ;;  %v5046_v46 = vpack.c.bf16 %v4860_v15, %v4856_v14 }
 0x476   :  { %3933 = vmatprep.mubr.msk.f32.mxu0 %vm208_vm1, %v840_v49  ;;  %v842_v50 = vmul.f32 %v837_v47, %v4864_v16  ;;  %v843_v24 = vmul.f32 %v837_v47, %v4872_v18  ;;  %v5052_v47 = vpack.c.bf16 %v4872_v18, %v4864_v16 }
 0x477   :  { %3934 = vmatmul.mubr.msk.f32.vlgmr.msra.gmra.mrb[8].mxu0 %vm208_vm1, %v841_v48 }
 0x478   :  { %3936 = vmatprep.mubr.msk.f32.mxu0 %vm208_vm1, %v842_v50  ;;  %v190_v50 = vld [vmem:[#allocation16] sm:$0xff] }
 0x47b   :  { %3937 = vmatmul.mubr.msk.f32.gmra.mrb[10].mxu0 %vm208_vm1, %v843_v24  ;;  %v191_v24 = vld [vmem:[#allocation16 + $0x8] sm:$0xff] }
 0x47c   :  { %3950 = vmatprep.mubr.msk.f32.mxu0 %vm4635_vm0, %v4636_v1 }
 0x54a   :  { %v3935_v54 = vpop.f32.mrb[8].mxu0 }
 0x54b   :  { %v928_v55 = vadd.f32 %v3935_v54, %v4993_v52  ;;  %v922_v56 = vpop.f32.mrb[9].mxu0  ;;  %v5056_v54 = vpack.c.bf16 %v191_v24, %v190_v50 }
 0x54c   :  { %v923_v57 = vadd.f32 %v922_v56, %v4996_v53  ;;  %v192_v56 = vld [vmem:[#allocation16 + $0x10] sm:$0xff] }
 0x54e   :  { %v4230_v37 = vpack.c.bf16 %v928_v55, %v923_v57  ;;  %v3938_v60 = vpop.f32.mrb[10].mxu0  ;;  %v193_v57 = vld [vmem:[#allocation16 + $0x18] sm:$0xff] }
 0x54f   :  { %v938_v61 = vadd.f32 %v3938_v60, %v5001_v58  ;;  %v932_v62 = vpop.f32.mrb[11].mxu0  ;;  %v5060_v60 = vpack.c.bf16 %v193_v57, %v192_v56 }
 0x550   :  { %v933_v63 = vadd.f32 %v932_v62, %v5010_v36  ;;  %4232 = vmatpush3.bf16.xpose.msk.msra.mxu1 %vm5005_vm5, %v4230_v37  ;;  %v186_v62 = vld [vmem:[#allocation15] sm:$0xff] }
 0x551   :  { %4237 = vmatprep.subr.bf16.mxu1 %v4634_v0 }
 0x552   :  { %v4234_v3 = vpack.c.bf16 %v938_v61, %v933_v63  ;;  %v187_v63 = vld [vmem:[#allocation15 + $0x8] sm:$0xff] }
 0x554   :  { %4236 = vmatpush3.bf16.xpose.msk.msra.mxu0 %vm5005_vm5, %v4234_v3  ;;  %v5083_v3 = vpack.c.bf16 %v187_v63, %v186_v62 }
 0x555   :  { %4240 = vmatprep.subr.bf16.mxu0 %v4634_v0 }
 0x557   :  { %3944 = vmatmul.mubr.msk.f32.vlgmr.msra.gmra.mrb[8].mxu1 %vm208_vm1, %v947_v39  ;;  %v188_v39 = vld [vmem:[#allocation15 + $0x10] sm:$0xff] }
 0x558   :  { %3957 = vmatprep.mubr.msk.f32.mxu1 %vm4635_vm0, %v4636_v1  ;;  %4239 = vmatpush3.bf16.msra.mxu1 %v5046_v46 }
 0x559   :  { %4243 = vmatprep.subr.bf16.mxu1 %v4634_v0 }
 0x55b   :  { %3951 = vmatmul.mubr.msk.f32.vlgmr.msra.gmra.mrb[12].mxu0 %vm208_vm1, %v948_v4  ;;  %v189_v4 = vld [vmem:[#allocation15 + $0x18] sm:$0xff] }
 0x55c   :  { %3964 = vmatprep.mubr.msk.f32.mxu0 %vm4635_vm0, %v4636_v1  ;;  %4242 = vmatpush3.bf16.msra.mxu0 %v5052_v47 }
 0x55d   :  { %4249 = vmatprep.subr.bf16.mxu0 %v4634_v0 }
 0x62a   :  { %v1025_v7 = vpop.f32.mrb[8].mxu1 }
 0x62b   :  { %v1026_v8 = vadd.f32 %v1025_v7, %v5036_v6  ;;  %v3945_v10 = vpop.f32.mrb[9].mxu1  ;;  %v5087_v7 = vpack.c.bf16 %v189_v4, %v188_v39 }
 0x62d   :  { %v1109_v11 = vsel %vm1108_vm6, %v1026_v8, -inf }
 0x62e   :  { %v1104_v20 = vpop.f32.mrb[12].mxu0  ;;  %1110 = vmax.xlane.f32.xlu0 %v1109_v11 }
 0x62f   :  { %v1105_v21 = vadd.f32 %v1104_v20, %v5036_v6  ;;  %v3952_v23 = vpop.f32.mrb[13].mxu0 }
 0x631   :  { %v1112_v25 = vsel %vm1108_vm6, %v1105_v21, -inf }
 0x632   :  { %1113 = vmax.xlane.f32.xlu1 %v1112_v25 }
 0x6bb   :  { %v1111_v27 = vpop.xlane.xlu0 %1110 }
 0x6bc   :  { %v1115_v28 = vsub.f32 %v1026_v8, %v1111_v27  ;;  %v1433_v27 = vld [vmem:[#allocation7 + $0x2] sm:$0x3] }
 0x6be   :  { %v1117_v30 = vmul.f32 1.442695, %v1115_v28 }
 0x6bf   :  { %v1114_v33 = vpop.xlane.xlu1 %1113 }
 0x6c0   :  { %4372 = vpow2.f32 %v1117_v30  ;;  %v1116_v34 = vsub.f32 %v1105_v21, %v1114_v33 }
 0x6c2   :  { %v1119_v35 = vmul.f32 1.442695, %v1116_v34 }
 0x6c4   :  { %4374 = vpow2.f32 %v1119_v35 }
 0x6ca   :  { %v4373_v41 = vpop.eup %4372 }
 0x6cb   :  { %v1121_v43 = vsel %vm1108_vm6, %v4373_v41, 0.0 }
 0x6cc   :  { %1122 = vadd.xlane.f32.xlu0 %v1121_v43 }
 0x6ce   :  { %v4375_v44 = vpop.eup %4374 }
 0x6cf   :  { %v1124_v45 = vsel %vm1108_vm6, %v4375_v44, 0.0 }
 0x6d0   :  { %1125 = vadd.xlane.f32.xlu1 %v1124_v45 }
 0x759   :  { %v1123_v48 = vpop.xlane.xlu0 %1122 }
 0x75a   :  { %4376 = vrcp.f32 %v1123_v48 }
 0x75d   :  { %v1126_v49 = vpop.xlane.xlu1 %1125 }
 0x75e   :  { %4378 = vrcp.f32 %v1126_v49 }
 0x764   :  { %v4377_v51 = vpop.eup %4376 }
 0x765   :  { %v1128_v55 = vmul.f32 %v4377_v51, %v4373_v41 }
 0x767   :  { %3958 = vmatmul.mubr.msk.f32.vlgmr.msra.gmra.mrb[10].mxu1 %vm1131_vm7, %v1128_v55 }
 0x768   :  { %v4379_v37 = vpop.eup %4378  ;;  %4245 = vmatpush3.bf16.msra.mxu1 %v5056_v54  ;;  %3975 = vmatprep.mubr.msk.f32.mxu1 %vm4635_vm0, %v4636_v1 }
 0x769   :  { %v1130_v61 = vmul.f32 %v4379_v37, %v4375_v44  ;;  %4246 = vmatprep.subr.bf16.mxu1 %v4634_v0 }
 0x76b   :  { %3965 = vmatmul.mubr.msk.f32.vlgmr.msra.gmra.mrb[14].mxu0 %vm1131_vm7, %v1130_v61 }
 0x76c   :  { %4248 = vmatpush3.bf16.msra.mxu1 %v5060_v60  ;;  %3986 = vmatprep.mubr.msk.f32.mxu0 %vm4635_vm0, %v4636_v1 }
 0x76d   :  { %4255 = vmatprep.subr.bf16.mxu1 %v4634_v0  ;;  %4251 = vmatpush3.bf16.msra.mxu0 %v5083_v3 }
 0x76e   :  { %4252 = vmatprep.subr.bf16.mxu0 %v4634_v0 }
 0x76f   :  { %3976 = vmatmul.mubr.f32.vlgmr.msra.gmra.mrb[12].mxu1 %v4636_v1 }
 0x770   :  { %4257 = vmatpush3.bf16.msra.mxu1 %v4844_v5  ;;  %3997 = vmatprep.mubr.msk.f32.mxu1 %vm4635_vm0, %v4636_v1 }
 0x771   :  { %4258 = vmatprep.subr.bf16.mxu1 %v4634_v0  ;;  %4254 = vmatpush3.bf16.msra.mxu0 %v5087_v7 }
 0x772   :  { %4000 = vmatprep.subr.mxu0 %v4636_v1 }
 0x774   :  { %4260 = vmatpush3.bf16.msra.mxu1 %v4847_v12 }
 0x775   :  { %4010 = vmatprep.subr.mxu1 %v4636_v1 }
 0x777   :  { %3998 = vmatmul.mubr.msk.f32.vlgmr.msra.gmra.mrb[14].mxu1 %vm208_vm1, %v4963_v31 }
 0x778   :  { %4011 = vmatpush3.msra.mxu1 %v4866_v17  ;;  %4012 = vmatprep.mubr.msk.f32.mxu1 %vm4635_vm0, %v4636_v1 }
 0x779   :  { %4261 = vmatprep.subr.bf16.mxu1 %v4634_v0 }
 0x83a   :  { %v1201_v31 = vpop.f32.mrb[10].mxu1 }
 0x83b   :  { %v3959_v8 = vpop.f32.mrb[11].mxu1 }
 0x83e   :  { %v1274_v10 = vpop.f32.mrb[14].mxu0 }
 0x83f   :  { %v1350_v11 = vrot.slane %v1274_v10, 7  ;;  %v3966_v20 = vpop.f32.mrb[15].mxu0 }
 0x841   :  { %v1352_v21 = vsel %vm1351_vm4, %v1350_v11, %v1201_v31 }
 0x842   :  { %v1344_v23 = vpop.f32.mrb[12].mxu1  ;;  %3987 = vmatmul.mubr.msk.f32.vlgmr.msra.gmra.mrb[16].mxu0 %vm208_vm1, %v1352_v21 }
 0x843   :  { %v3977_v25 = vpop.f32.mrb[13].mxu1  ;;  %4001 = vmatpush3.xpose.msk.msra.mxu0 %vm208_vm1, %v4866_v17  ;;  %4002 = vmatprep.mubr.msk.f32.mxu0 %vm4635_vm0, %v4636_v1 }
 0x844   :  { %4005 = vmatprep.subr.mxu0 %v4636_v1 }
 0x84a   :  { %v1506_v28 = vpop.f32.mrb[14].mxu1 }
 0x84b   :  { %v1507_v30 = vadd.f32 %v1506_v28, %v1433_v27  ;;  %v3999_v33 = vpop.f32.mrb[15].mxu1 }
 0x84d   :  { %v1510_v34 = vmul.f32 %v4889_v26, %v1507_v30 }
 0x84f   :  { %v1518_v35 = vrot.slane %v1510_v34, %v4892_v29  ;;  %v5127_v34 = vld [vmem:[%s5353_s15] ss:$0 sm:$0xff]  ;;  %s4638_s15 = smov [#allocation18]  }
 0x850   :  { %s3632_s18 = sshll.u32 %s4638_s15, 4  ;;  %s3633_s18 = int_to_ptr.vmem [resolvable:$true] %s3632_s18 }
 0x851   :  { %v1519_v41 = vcombine.high %v1518_v35, %v1518_v35  ;;  %v1526_v43 = vrot.slane %v1518_v35, %v4892_v29  ;;  %s4588_s2 = scalar_lea.vmem %s3633_s18, 32  ;;  %p4593_p9 = scmp.lt.s32.totalorder %s3633_s18, %s3633_s18 }
 0x852   :  { %p4589_p8 = scmp.ne.s32.totalorder %s3633_s18, %s4588_s2  ;;  %p4594_p10 = scmp.lt.s32.totalorder %s4588_s2, %s4588_s2 }
 0x853   :  { %4003 = vmatmul.mubr.msk.f32.vlgmr.msra.gmra.mrb[18].mxu0 %vm208_vm1, %v1526_v43  ;;  %v1533_v44 = vrot.slane %v1519_v41, %v4892_v29 }
 0x854   :  { %4006 = vmatpush3.xpose.msk.msra.mxu0 %vm208_vm1, %v4876_v19  ;;  %4007 = vmatprep.mubr.msk.f32.mxu0 %vm4635_vm0, %v4636_v1  ;;  %p4595_p11 = por %p4594_p10, %p4593_p9 }
 0x855   :  { %4015 = vmatprep.subr.mxu0 %v4636_v1 }
 0x856   :  { %p4596_p12 = pnand %p4595_p11, %p4589_p8 }
 0x857   :  { %4008 = vmatmul.mubr.msk.f32.vlgmr.msra.gmra.mrb[20].mxu0 %vm208_vm1, %v1533_v44 }
 0x858   :  { %4016 = vmatpush3.msra.mxu0 %v4876_v19  ;;  %4017 = vmatprep.mubr.msk.f32.mxu0 %vm4635_vm0, %v4636_v1 }
 0x859   :  { %4268 = vmatprep.subr.bf16.mxu0 %v4947_v13 }
 0x915   :  { %v1421_v45 = vpop.f32.mrb[16].mxu0 }
 0x916   :  { %v1422_v48 = vadd.f32 %v1421_v45, %v1344_v23  ;;  %v3988_v49 = vpop.f32.mrb[17].mxu0 }
 0x918   :  { %v5133_v35 = vadd.f32 %v5127_v34, %v1422_v48 }
 0x926   :  { %v1602_v50 = vpop.f32.mrb[18].mxu0 }
 0x927   :  { %v1603_v24 = vadd.f32 %v1602_v50, %v4918_v40  ;;  %v4004_v51 = vpop.f32.mrb[19].mxu0 }
 0x929   :  { %v1678_v55 = vsel %vm561_vm2, %v1603_v24, -inf }
 0x92a   :  { %1679 = vmax.xlane.f32.xlu0 %v1678_v55  ;;  %v1674_v56 = vpop.f32.mrb[20].mxu0 }
 0x92b   :  { %v1675_v57 = vadd.f32 %v1674_v56, %v4918_v40  ;;  %v4009_v37 = vpop.f32.mrb[21].mxu0 }
 0x92d   :  { %v1681_v61 = vsel %vm561_vm2, %v1675_v57, -inf }
 0x92e   :  { %1682 = vmax.xlane.f32.xlu0 %v1681_v61 }
 0x9b7   :  { %v1680_v62 = vpop.xlane.xlu0 %1679 }
 0x9b8   :  { %v1684_v63 = vsub.f32 %v1603_v24, %v1680_v62 }
 0x9ba   :  { %v1686_v39 = vmul.f32 1.442695, %v1684_v63 }
 0x9bb   :  { %v1683_v4 = vpop.xlane.xlu0 %1682 }
 0x9bc   :  { %4380 = vpow2.f32 %v1686_v39  ;;  %v1685_v31 = vsub.f32 %v1675_v57, %v1683_v4 }
 0x9be   :  { %v1688_v8 = vmul.f32 1.442695, %v1685_v31 }
 0x9c0   :  { %4382 = vpow2.f32 %v1688_v8 }
 0x9c6   :  { %v4381_v10 = vpop.eup %4380 }
 0x9c7   :  { %v1690_v11 = vsel %vm561_vm2, %v4381_v10, 0.0 }
 0x9c8   :  { %1691 = vadd.xlane.f32.xlu1 %v1690_v11 }
 0x9ca   :  { %v4383_v20 = vpop.eup %4382 }
 0x9cb   :  { %v1693_v21 = vsel %vm561_vm2, %v4383_v20, 0.0 }
 0x9cc   :  { %1694 = vadd.xlane.f32.xlu1 %v1693_v21 }
 0xa55   :  { %v1692_v23 = vpop.xlane.xlu1 %1691 }
 0xa56   :  { %4384 = vrcp.f32 %v1692_v23 }
 0xa59   :  { %v1695_v25 = vpop.xlane.xlu1 %1694 }
 0xa5a   :  { %4386 = vrcp.f32 %v1695_v25 }
 0xa60   :  { %v4385_v27 = vpop.eup %4384 }
 0xa61   :  { %v1697_v28 = vmul.f32 %v4385_v27, %v4381_v10 }
 0xa63   :  { %4013 = vmatmul.mubr.msk.f32.vlgmr.msra.gmra.mrb[16].mxu1 %vm584_vm3, %v1697_v28 }
 0xa64   :  { %v4387_v30 = vpop.eup %4386  ;;  %4263 = vmatpush3.bf16.msra.mxu1 %v4926_v2  ;;  %4028 = vmatprep.mubr.msk.f32.mxu1 %vm4635_vm0, %v4636_v1 }
 0xa65   :  { %v1699_v33 = vmul.f32 %v4387_v30, %v4383_v20  ;;  %4264 = vmatprep.subr.bf16.mxu1 %v4634_v0 }
 0xa67   :  { %4018 = vmatmul.mubr.msk.f32.vlgmr.msra.gmra.mrb[22].mxu0 %vm584_vm3, %v1699_v33 }
 0xa68   :  { %4266 = vmatpush3.bf16.msra.mxu1 %v4930_v9  ;;  %4270 = vmatpush3.bf16.msra.mxu0 %v4947_v13 }
 0xa69   :  { %4272 = vmatprep.subr.bf16.mxu0 %v4957_v22  ;;  %4275 = vmatprep.subr.bf16.mxu1 %v4634_v0 }
 0xa6b   :  { %4029 = vmatmul.mubr.msk.f32.vlgmr.msra.gmra.mrb[18].mxu1 %vm208_vm1, %v5133_v35 }
 0xa6c   :  { %4274 = vmatpush3.bf16.msra.mxu0 %v4957_v22  ;;  %4049 = vmatprep.mubr.msk.f32.mxu1 %vm4635_vm0, %v4636_v1 }
 0xa6d   :  { %4279 = vmatprep.subr.bf16.mxu0 %v4634_v0 }
 0xb36   :  { %v1769_v41 = vpop.f32.mrb[16].mxu1 }
 0xb37   :  { %v4014_v43 = vpop.f32.mrb[17].mxu1  ;;  %v2053_v33 = vmul.f32 %v5020_v38, %v1769_v41 }
 0xb3a   :  { %v1842_v44 = vpop.f32.mrb[22].mxu0 }
 0xb3b   :  { %v2532_v45 = vrot.slane %v1842_v44, 7  ;;  %v4019_v48 = vpop.f32.mrb[23].mxu0  ;;  %v2054_v43 = vmul.f32 %v5020_v38, %v1842_v44 }
 0xb3d   :  { %v5144_v49 = vsel %vm1351_vm4, %v2532_v45, %v1769_v41 }
 0xb3e   :  { %v1915_v50 = vpop.f32.mrb[18].mxu1 }
 0xb3f   :  { %v1916_v24 = vadd.f32 %v4968_v32, %v1915_v50  ;;  %v4030_v51 = vpop.f32.mrb[19].mxu1 }
 0xb41   :  { %v1926_v55 = vrot.slane %v1916_v24, %v4892_v29 }
 0xb43   :  { %v1927_v56 = vcombine.high %v1926_v55, %v1926_v55  ;;  %v1934_v57 = vrot.slane %v1926_v55, %v4892_v29 }
 0xb45   :  { %v1941_v37 = vrot.slane %v1927_v56, %v4892_v29  ;;  %v1945_v61 = vrot.slane %v1934_v57, %v4973_v42 }
 0xb47   :  { %v1949_v62 = vrot.slane %v1941_v37, %v4973_v42  ;;  %v1953_v63 = vmul.f32 %v1945_v61, %v4860_v15  ;;  %v1952_v39 = vmul.f32 %v1945_v61, %v4856_v14 }
 0xb49   :  { %4039 = vmatprep.mubr.msk.f32.mxu0 %vm208_vm1, %v1952_v39  ;;  %v1954_v4 = vmul.f32 %v1949_v62, %v4864_v16  ;;  %v1955_v31 = vmul.f32 %v1949_v62, %v4872_v18 }
 0xb4a   :  { %4040 = vmatmul.mubr.msk.f32.vlgmr.msra.gmra.mrb[24].mxu0 %vm208_vm1, %v1953_v63 }
 0xb4b   :  { %4042 = vmatprep.mubr.msk.f32.mxu0 %vm208_vm1, %v1954_v4 }
 0xb4e   :  { %4043 = vmatmul.mubr.msk.f32.gmra.mrb[26].mxu0 %vm208_vm1, %v1955_v31 }
 0xb4f   :  { %4056 = vmatprep.mubr.msk.f32.mxu0 %vm4635_vm0, %v4636_v1 }
 0xc1d   :  { %v4041_v8 = vpop.f32.mrb[24].mxu0 }
 0xc1e   :  { %v2040_v10 = vadd.f32 %v4041_v8, %v4993_v52  ;;  %v2034_v11 = vpop.f32.mrb[25].mxu0 }
 0xc1f   :  { %v2035_v20 = vadd.f32 %v2034_v11, %v4996_v53 }
 0xc21   :  { %v4276_v21 = vpack.c.bf16 %v2040_v10, %v2035_v20  ;;  %v4044_v23 = vpop.f32.mrb[26].mxu0 }
 0xc22   :  { %v2050_v25 = vadd.f32 %v4044_v23, %v5001_v58  ;;  %v2044_v27 = vpop.f32.mrb[27].mxu0 }
 0xc23   :  { %v2045_v28 = vadd.f32 %v2044_v27, %v5010_v36  ;;  %4278 = vmatpush3.bf16.xpose.msk.msra.mxu1 %vm5005_vm5, %v4276_v21 }
 0xc24   :  { %4283 = vmatprep.subr.bf16.mxu1 %v4634_v0 }
 0xc25   :  { %v4280_v30 = vpack.c.bf16 %v2050_v25, %v2045_v28 }
 0xc27   :  { %4282 = vmatpush3.bf16.xpose.msk.msra.mxu0 %vm5005_vm5, %v4280_v30 }
 0xc28   :  { %4286 = vmatprep.subr.bf16.mxu0 %v4634_v0 }
 0xc2a   :  { %4050 = vmatmul.mubr.msk.f32.vlgmr.msra.gmra.mrb[20].mxu1 %vm208_vm1, %v2053_v33 }
 0xc2b   :  { %4285 = vmatpush3.bf16.msra.mxu1 %v5046_v46  ;;  %4063 = vmatprep.mubr.msk.f32.mxu1 %vm4635_vm0, %v4636_v1 }
 0xc2c   :  { %4289 = vmatprep.subr.bf16.mxu1 %v4634_v0 }
 0xc2e   :  { %4057 = vmatmul.mubr.msk.f32.vlgmr.msra.gmra.mrb[28].mxu0 %vm208_vm1, %v2054_v43 }
 0xc2f   :  { %4288 = vmatpush3.bf16.msra.mxu0 %v5052_v47  ;;  %4070 = vmatprep.mubr.msk.f32.mxu0 %vm4635_vm0, %v4636_v1 }
 0xc30   :  { %4295 = vmatprep.subr.bf16.mxu0 %v4634_v0 }
 0xcfd   :  { %v2130_v41 = vpop.f32.mrb[20].mxu1 }
 0xcfe   :  { %v2131_v45 = vadd.f32 %v2130_v41, %v5036_v6  ;;  %v4051_v48 = vpop.f32.mrb[21].mxu1 }
 0xd00   :  { %v2213_v50 = vsel %vm1108_vm6, %v2131_v45, -inf }
 0xd01   :  { %v2209_v24 = vpop.f32.mrb[28].mxu0  ;;  %2214 = vmax.xlane.f32.xlu0 %v2213_v50 }
 0xd02   :  { %v2210_v44 = vadd.f32 %v2209_v24, %v5036_v6  ;;  %v4058_v51 = vpop.f32.mrb[29].mxu0 }
 0xd04   :  { %v2216_v55 = vsel %vm1108_vm6, %v2210_v44, -inf }
 0xd05   :  { %2217 = vmax.xlane.f32.xlu1 %v2216_v55 }
 0xd8e   :  { %v2215_v56 = vpop.xlane.xlu0 %2214 }
 0xd8f   :  { %v2219_v57 = vsub.f32 %v2131_v45, %v2215_v56 }
 0xd91   :  { %v2221_v37 = vmul.f32 1.442695, %v2219_v57 }
 0xd92   :  { %v2218_v61 = vpop.xlane.xlu1 %2217 }
 0xd93   :  { %4388 = vpow2.f32 %v2221_v37  ;;  %v2220_v62 = vsub.f32 %v2210_v44, %v2218_v61 }
 0xd95   :  { %v2223_v63 = vmul.f32 1.442695, %v2220_v62 }
 0xd97   :  { %4390 = vpow2.f32 %v2223_v63 }
 0xd9d   :  { %v4389_v39 = vpop.eup %4388 }
 0xd9e   :  { %v2225_v4 = vsel %vm1108_vm6, %v4389_v39, 0.0 }
 0xd9f   :  { %2226 = vadd.xlane.f32.xlu0 %v2225_v4 }
 0xda1   :  { %v4391_v31 = vpop.eup %4390 }
 0xda2   :  { %v2228_v8 = vsel %vm1108_vm6, %v4391_v31, 0.0 }
 0xda3   :  { %2229 = vadd.xlane.f32.xlu1 %v2228_v8 }
 0xe2c   :  { %v2227_v10 = vpop.xlane.xlu0 %2226 }
 0xe2d   :  { %4392 = vrcp.f32 %v2227_v10 }
 0xe30   :  { %v2230_v11 = vpop.xlane.xlu1 %2229 }
 0xe31   :  { %4394 = vrcp.f32 %v2230_v11 }
 0xe37   :  { %v4393_v20 = vpop.eup %4392 }
 0xe38   :  { %v2232_v21 = vmul.f32 %v4393_v20, %v4389_v39 }
 0xe3a   :  { %4064 = vmatmul.mubr.msk.f32.vlgmr.msra.gmra.mrb[22].mxu1 %vm1131_vm7, %v2232_v21 }
 0xe3b   :  { %v4395_v23 = vpop.eup %4394  ;;  %4291 = vmatpush3.bf16.msra.mxu1 %v5056_v54  ;;  %4081 = vmatprep.mubr.msk.f32.mxu1 %vm4635_vm0, %v4636_v1 }
 0xe3c   :  { %v2234_v25 = vmul.f32 %v4395_v23, %v4391_v31  ;;  %4292 = vmatprep.subr.bf16.mxu1 %v4634_v0 }
 0xe3e   :  { %4071 = vmatmul.mubr.msk.f32.vlgmr.msra.gmra.mrb[30].mxu0 %vm1131_vm7, %v2234_v25 }
 0xe3f   :  { %4294 = vmatpush3.bf16.msra.mxu1 %v5060_v60  ;;  %4297 = vmatpush3.bf16.msra.mxu0 %v5083_v3 }
 0xe40   :  { %4301 = vmatprep.subr.bf16.mxu1 %v4634_v0  ;;  %4298 = vmatprep.subr.bf16.mxu0 %v4634_v0 }
 0xe41   :  { %4092 = vmatprep.mubr.msk.f32.mxu0 %vm4635_vm0, %v4636_v1 }
 0xe42   :  { %4082 = vmatmul.mubr.msk.f32.vlgmr.msra.gmra.mrb[24].mxu1 %vm208_vm1, %v5133_v35 }
 0xe43   :  { %4303 = vmatpush3.bf16.msra.mxu1 %v4844_v5  ;;  %4103 = vmatprep.mubr.msk.f32.mxu1 %vm4635_vm0, %v4636_v1 }
 0xe44   :  { %4304 = vmatprep.subr.bf16.mxu1 %v4634_v0  ;;  %4300 = vmatpush3.bf16.msra.mxu0 %v5087_v7 }
 0xe45   :  { %4106 = vmatprep.subr.mxu0 %v4636_v1 }
 0xe47   :  { %4306 = vmatpush3.bf16.msra.mxu1 %v4847_v12 }
 0xe48   :  { %4116 = vmatprep.subr.mxu1 %v4636_v1 }
 0xe4a   :  { %4104 = vmatmul.mubr.msk.f32.vlgmr.msra.gmra.mrb[26].mxu1 %vm208_vm1, %v5144_v49  ;;  %v2529_v49 = vld [vmem:[#allocation7 + $0x4] sm:$0x3] }
 0xe4b   :  { %4117 = vmatpush3.msra.mxu1 %v4866_v17  ;;  %4118 = vmatprep.mubr.msk.f32.mxu1 %vm4635_vm0, %v4636_v1 }
 0xe4c   :  { %4307 = vmatprep.subr.bf16.mxu1 %v4634_v0 }
 0xf0d   :  { %v2304_v5 = vpop.f32.mrb[22].mxu1 }
 0xf0e   :  { %v4065_v35 = vpop.f32.mrb[23].mxu1 }
 0xf11   :  { %v2377_v27 = vpop.f32.mrb[30].mxu0 }
 0xf12   :  { %v2453_v28 = vrot.slane %v2377_v27, 7  ;;  %v4072_v30 = vpop.f32.mrb[31].mxu0 }
 0xf14   :  { %v2454_v33 = vsel %vm1351_vm4, %v2453_v28, %v2304_v5 }
 0xf15   :  { %v2447_v12 = vpop.f32.mrb[24].mxu1  ;;  %4093 = vmatmul.mubr.msk.f32.vlgmr.msra.gmra.mrb[32].mxu0 %vm208_vm1, %v2454_v33 }
 0xf16   :  { %v4083_v43 = vpop.f32.mrb[25].mxu1  ;;  %4107 = vmatpush3.xpose.msk.msra.mxu0 %vm208_vm1, %v4866_v17  ;;  %4108 = vmatprep.mubr.msk.f32.mxu0 %vm4635_vm0, %v4636_v1 }
 0xf17   :  { %4111 = vmatprep.subr.mxu0 %v4636_v1 }
 0xf1d   :  { %v2602_v41 = vpop.f32.mrb[26].mxu1 }
 0xf1e   :  { %v2603_v45 = vadd.f32 %v2602_v41, %v2529_v49  ;;  %v4105_v48 = vpop.f32.mrb[27].mxu1 }
 0xf20   :  { %v2606_v50 = vmul.f32 %v4889_v26, %v2603_v45 }
 0xf22   :  { %v2614_v24 = vrot.slane %v2606_v50, %v4892_v29 }
 0xf24   :  { %v2615_v44 = vcombine.high %v2614_v24, %v2614_v24  ;;  %v2622_v51 = vrot.slane %v2614_v24, %v4892_v29 }
 0xf26   :  { %4109 = vmatmul.mubr.msk.f32.vlgmr.msra.gmra.mrb[34].mxu0 %vm208_vm1, %v2622_v51  ;;  %v2629_v17 = vrot.slane %v2615_v44, %v4892_v29 }
 0xf27   :  { %4112 = vmatpush3.xpose.msk.msra.mxu0 %vm208_vm1, %v4876_v19  ;;  %4113 = vmatprep.mubr.msk.f32.mxu0 %vm4635_vm0, %v4636_v1 }
 0xf28   :  { %4121 = vmatprep.subr.mxu0 %v4636_v1 }
 0xf2a   :  { %4114 = vmatmul.mubr.msk.f32.vlgmr.msra.gmra.mrb[36].mxu0 %vm208_vm1, %v2629_v17 }
 0xf2b   :  { %4122 = vmatpush3.msra.mxu0 %v4876_v19  ;;  %4123 = vmatprep.mubr.msk.f32.mxu0 %vm4635_vm0, %v4636_v1 }
 0xf2c   :  { %4314 = vmatprep.subr.bf16.mxu0 %v4947_v13 }
 0xfe8   :  { %v2523_v26 = vpop.f32.mrb[32].mxu0 }
 0xfe9   :  { %v2524_v55 = vadd.f32 %v2523_v26, %v2447_v12  ;;  %v4094_v56 = vpop.f32.mrb[33].mxu0 }
 0xfeb   :  { %v5255_v43 = vadd.f32 %v5127_v34, %v2524_v55 }
 0xff9   :  { %v2698_v57 = vpop.f32.mrb[34].mxu0 }
 0xffa   :  { %v2699_v37 = vadd.f32 %v2698_v57, %v4918_v40  ;;  %v4110_v61 = vpop.f32.mrb[35].mxu0 }
 0xffc   :  { %v2774_v62 = vsel %vm561_vm2, %v2699_v37, -inf }
 0xffd   :  { %2775 = vmax.xlane.f32.xlu0 %v2774_v62  ;;  %v2770_v63 = vpop.f32.mrb[36].mxu0 }
 0xffe   :  { %v2771_v39 = vadd.f32 %v2770_v63, %v4918_v40  ;;  %v4115_v4 = vpop.f32.mrb[37].mxu0 }
0x1000   :  { %v2777_v19 = vsel %vm561_vm2, %v2771_v39, -inf }
0x1001   :  { %2778 = vmax.xlane.f32.xlu0 %v2777_v19 }
0x108a   :  { %v2776_v31 = vpop.xlane.xlu0 %2775 }
0x108b   :  { %v2780_v8 = vsub.f32 %v2699_v37, %v2776_v31 }
0x108d   :  { %v2782_v10 = vmul.f32 1.442695, %v2780_v8 }
0x108e   :  { %v2779_v11 = vpop.xlane.xlu0 %2778 }
0x108f   :  { %4396 = vpow2.f32 %v2782_v10  ;;  %v2781_v20 = vsub.f32 %v2771_v39, %v2779_v11 }
0x1091   :  { %v2784_v21 = vmul.f32 1.442695, %v2781_v20 }
0x1093   :  { %4398 = vpow2.f32 %v2784_v21 }
0x1099   :  { %v4397_v23 = vpop.eup %4396 }
0x109a   :  { %v2786_v25 = vsel %vm561_vm2, %v4397_v23, 0.0 }
0x109b   :  { %2787 = vadd.xlane.f32.xlu1 %v2786_v25 }
0x109d   :  { %v4399_v5 = vpop.eup %4398 }
0x109e   :  { %v2789_v35 = vsel %vm561_vm2, %v4399_v5, 0.0 }
0x109f   :  { %2790 = vadd.xlane.f32.xlu1 %v2789_v35 }
0x1128   :  { %v2788_v40 = vpop.xlane.xlu1 %2787 }
0x1129   :  { %4400 = vrcp.f32 %v2788_v40 }
0x112c   :  { %v2791_v27 = vpop.xlane.xlu1 %2790 }
0x112d   :  { %4402 = vrcp.f32 %v2791_v27 }
0x1133   :  { %v4401_v28 = vpop.eup %4400 }
0x1134   :  { %v2793_v30 = vmul.f32 %v4401_v28, %v4397_v23 }
0x1136   :  { %4119 = vmatmul.mubr.msk.f32.vlgmr.msra.gmra.mrb[28].mxu1 %vm584_vm3, %v2793_v30 }
0x1137   :  { %v4403_v33 = vpop.eup %4402  ;;  %4309 = vmatpush3.bf16.msra.mxu1 %v4926_v2  ;;  %4134 = vmatprep.mubr.msk.f32.mxu1 %vm4635_vm0, %v4636_v1 }
0x1138   :  { %v2795_v12 = vmul.f32 %v4403_v33, %v4399_v5  ;;  %4310 = vmatprep.subr.bf16.mxu1 %v4634_v0 }
0x113a   :  { %4124 = vmatmul.mubr.msk.f32.vlgmr.msra.gmra.mrb[38].mxu0 %vm584_vm3, %v2795_v12 }
0x113b   :  { %4312 = vmatpush3.bf16.msra.mxu1 %v4930_v9  ;;  %4316 = vmatpush3.bf16.msra.mxu0 %v4947_v13 }
0x113c   :  { %4318 = vmatprep.subr.bf16.mxu0 %v4957_v22  ;;  %4321 = vmatprep.subr.bf16.mxu1 %v4634_v0 }
0x113e   :  { %4135 = vmatmul.mubr.msk.f32.vlgmr.msra.gmra.mrb[30].mxu1 %vm208_vm1, %v5255_v43 }
0x113f   :  { %4320 = vmatpush3.bf16.msra.mxu0 %v4957_v22  ;;  %4155 = vmatprep.mubr.msk.f32.mxu1 %vm4635_vm0, %v4636_v1 }
0x1140   :  { %4325 = vmatprep.subr.bf16.mxu0 %v4634_v0 }
0x1209   :  { %v2865_v2 = vpop.f32.mrb[28].mxu1 }
0x120a   :  { %v4120_v9 = vpop.f32.mrb[29].mxu1 }
0x120d   :  { %v2938_v13 = vpop.f32.mrb[38].mxu0 }
0x120e   :  { %v4125_v49 = vpop.f32.mrb[39].mxu0 }
0x1211   :  { %v3011_v41 = vpop.f32.mrb[30].mxu1 }
0x1212   :  { %v3012_v45 = vadd.f32 %v4968_v32, %v3011_v41  ;;  %v4136_v48 = vpop.f32.mrb[31].mxu1 }
0x1214   :  { %v3022_v50 = vrot.slane %v3012_v45, %v4892_v29 }
0x1216   :  { %v3023_v24 = vcombine.high %v3022_v50, %v3022_v50  ;;  %v3030_v44 = vrot.slane %v3022_v50, %v4892_v29 }
0x1218   :  { %v3037_v22 = vrot.slane %v3023_v24, %v4892_v29  ;;  %v3041_v51 = vrot.slane %v3030_v44, %v4973_v42 }
0x121a   :  { %v3045_v17 = vrot.slane %v3037_v22, %v4973_v42  ;;  %v3049_v26 = vmul.f32 %v3041_v51, %v4860_v15  ;;  %v3048_v55 = vmul.f32 %v3041_v51, %v4856_v14 }
0x121c   :  { %4145 = vmatprep.mubr.msk.f32.mxu0 %vm208_vm1, %v3048_v55  ;;  %v3050_v32 = vmul.f32 %v3045_v17, %v4864_v16  ;;  %v3051_v56 = vmul.f32 %v3045_v17, %v4872_v18 }
0x121d   :  { %4146 = vmatmul.mubr.msk.f32.vlgmr.msra.gmra.mrb[40].mxu0 %vm208_vm1, %v3049_v26 }
0x121e   :  { %4148 = vmatprep.mubr.msk.f32.mxu0 %vm208_vm1, %v3050_v32 }
0x1221   :  { %4149 = vmatmul.mubr.msk.f32.gmra.mrb[42].mxu0 %vm208_vm1, %v3051_v56 }
0x1222   :  { %4162 = vmatprep.mubr.msk.f32.mxu0 %vm4635_vm0, %v4636_v1 }
0x12f0   :  { %v4147_v29 = vpop.f32.mrb[40].mxu0 }
0x12f1   :  { %v3136_v15 = vadd.f32 %v4147_v29, %v4993_v52  ;;  %v3130_v42 = vpop.f32.mrb[41].mxu0  ;;  %v3149_v52 = vmul.f32 %v5020_v38, %v2865_v2 }
0x12f2   :  { %v3131_v14 = vadd.f32 %v3130_v42, %v4996_v53  ;;  %v3150_v53 = vmul.f32 %v5020_v38, %v2938_v13 }
0x12f4   :  { %v4322_v57 = vpack.c.bf16 %v3136_v15, %v3131_v14  ;;  %v4150_v37 = vpop.f32.mrb[42].mxu0 }
0x12f5   :  { %v3146_v16 = vadd.f32 %v4150_v37, %v5001_v58  ;;  %v3140_v61 = vpop.f32.mrb[43].mxu0 }
0x12f6   :  { %v3141_v62 = vadd.f32 %v3140_v61, %v5010_v36  ;;  %4324 = vmatpush3.bf16.xpose.msk.msra.mxu1 %vm5005_vm5, %v4322_v57 }
0x12f7   :  { %4329 = vmatprep.subr.bf16.mxu1 %v4634_v0 }
0x12f8   :  { %v4326_v18 = vpack.c.bf16 %v3146_v16, %v3141_v62 }
0x12fa   :  { %4328 = vmatpush3.bf16.xpose.msk.msra.mxu0 %vm5005_vm5, %v4326_v18 }
0x12fb   :  { %4332 = vmatprep.subr.bf16.mxu0 %v4634_v0 }
0x12fd   :  { %4156 = vmatmul.mubr.msk.f32.vlgmr.msra.gmra.mrb[32].mxu1 %vm208_vm1, %v3149_v52 }
0x12fe   :  { %4331 = vmatpush3.bf16.msra.mxu1 %v5046_v46  ;;  %4169 = vmatprep.mubr.msk.f32.mxu1 %vm4635_vm0, %v4636_v1 }
0x12ff   :  { %4335 = vmatprep.subr.bf16.mxu1 %v4634_v0 }
0x1301   :  { %4163 = vmatmul.mubr.msk.f32.vlgmr.msra.gmra.mrb[44].mxu0 %vm208_vm1, %v3150_v53 }
0x1302   :  { %4334 = vmatpush3.bf16.msra.mxu0 %v5052_v47  ;;  %4176 = vmatprep.mubr.msk.f32.mxu0 %vm4635_vm0, %v4636_v1 }
0x1303   :  { %4341 = vmatprep.subr.bf16.mxu0 %v4634_v0 }
0x13d0   :  { %v3226_v58 = vpop.f32.mrb[32].mxu1 }
0x13d1   :  { %v3227_v59 = vadd.f32 %v3226_v58, %v5036_v6  ;;  %v4157_v36 = vpop.f32.mrb[33].mxu1 }
0x13d3   :  { %v3309_v46 = vsel %vm1108_vm6, %v3227_v59, -inf }
0x13d4   :  { %v3305_v63 = vpop.f32.mrb[44].mxu0  ;;  %3310 = vmax.xlane.f32.xlu1 %v3309_v46 }
0x13d5   :  { %v3306_v38 = vadd.f32 %v3305_v63, %v5036_v6  ;;  %v4164_v39 = vpop.f32.mrb[45].mxu0 }
0x13d7   :  { %v3312_v4 = vsel %vm1108_vm6, %v3306_v38, -inf }
0x13d8   :  { %3313 = vmax.xlane.f32.xlu0 %v3312_v4 }
0x1461   :  { %v3311_v47 = vpop.xlane.xlu1 %3310 }
0x1462   :  { %v3315_v19 = vsub.f32 %v3227_v59, %v3311_v47 }
0x1464   :  { %v3317_v31 = vmul.f32 1.442695, %v3315_v19 }
0x1465   :  { %v3314_v8 = vpop.xlane.xlu0 %3313 }
0x1466   :  { %4404 = vpow2.f32 %v3317_v31  ;;  %v3316_v10 = vsub.f32 %v3306_v38, %v3314_v8 }
0x1468   :  { %v3319_v11 = vmul.f32 1.442695, %v3316_v10 }
0x146a   :  { %4406 = vpow2.f32 %v3319_v11 }
0x1470   :  { %v4405_v20 = vpop.eup %4404 }
0x1471   :  { %v3321_v21 = vsel %vm1108_vm6, %v4405_v20, 0.0 }
0x1472   :  { %3322 = vadd.xlane.f32.xlu1 %v3321_v21 }
0x1474   :  { %v4407_v23 = vpop.eup %4406 }
0x1475   :  { %v3324_v25 = vsel %vm1108_vm6, %v4407_v23, 0.0 }
0x1476   :  { %3325 = vadd.xlane.f32.xlu0 %v3324_v25 }
0x14ff   :  { %v3323_v6 = vpop.xlane.xlu1 %3322 }
0x1500   :  { %4408 = vrcp.f32 %v3323_v6 }
0x1503   :  { %v3326_v5 = vpop.xlane.xlu0 %3325 }
0x1504   :  { %4410 = vrcp.f32 %v3326_v5 }
0x150a   :  { %v4409_v35 = vpop.eup %4408 }
0x150b   :  { %v3328_v40 = vmul.f32 %v4409_v35, %v4405_v20 }
0x150d   :  { %4170 = vmatmul.mubr.msk.f32.vlgmr.msra.gmra.mrb[34].mxu1 %vm1131_vm7, %v3328_v40 }
0x150e   :  { %v4411_v27 = vpop.eup %4410  ;;  %4337 = vmatpush3.bf16.msra.mxu1 %v5056_v54  ;;  %4187 = vmatprep.mubr.msk.f32.mxu1 %vm4635_vm0, %v4636_v1 }
0x150f   :  { %v3330_v28 = vmul.f32 %v4411_v27, %v4407_v23  ;;  %4338 = vmatprep.subr.bf16.mxu1 %v4634_v0 }
0x1511   :  { %4177 = vmatmul.mubr.msk.f32.vlgmr.msra.gmra.mrb[46].mxu0 %vm1131_vm7, %v3330_v28 }
0x1512   :  { %4340 = vmatpush3.bf16.msra.mxu1 %v5060_v60  ;;  %4343 = vmatpush3.bf16.msra.mxu0 %v5083_v3 }
0x1513   :  { %4344 = vmatprep.subr.bf16.mxu0 %v4634_v0  ;;  %4198 = vmatprep.mubr.msk.f32.mxu0 %vm4635_vm0, %v4636_v1 }
0x1515   :  { %4188 = vmatmul.mubr.msk.f32.vlgmr.msra.gmra.mrb[36].mxu1 %vm208_vm1, %v5255_v43 }
0x1516   :  { %4346 = vmatpush3.bf16.msra.mxu0 %v5087_v7 }
0x15e0   :  { %v3400_v54 = vpop.f32.mrb[34].mxu1 }
0x15e1   :  { %v4171_v30 = vpop.f32.mrb[35].mxu1 }
0x15e4   :  { %v3473_v33 = vpop.f32.mrb[46].mxu0 }
0x15e5   :  { %v3549_v12 = vrot.slane %v3473_v33, 7  ;;  %v4178_v2 = vpop.f32.mrb[47].mxu0 }
0x15e7   :  { %v3550_v9 = vsel %vm1351_vm4, %v3549_v12, %v3400_v54 }
0x15e8   :  { %v3543_v60 = vpop.f32.mrb[36].mxu1  ;;  %4199 = vmatmul.mubr.msk.f32.vlgmr.msra.gmra.mrb[48].mxu0 %vm208_vm1, %v3550_v9 }
0x15e9   :  { %v4189_v3 = vpop.f32.mrb[37].mxu1 }
0x16bb   :  { %v3619_v0 = vpop.f32.mrb[48].mxu0 }
0x16bc   :  { %v3620_v1 = vadd.f32 %v3619_v0, %v3543_v60  ;;  %v4200_v13 = vpop.f32.mrb[49].mxu0 }
0x16be   :  { %v3623_v43 = vadd.f32 %v5127_v34, %v3620_v1 }
0x16c0   :  { %3625 = vst.msk [vmem:[#allocation18] sm:$0x3] %vm3624_vm8, %v3623_v43 }
0x16c1   :  { %4599 = shalt.err (!%p4596_p12)
}
0x16c2   :  { %s5362_s20 = sld [smem:[#allocation26_spill]] }
0x16c8   :  { %s4600_s23 = scalar_lea.hbm %s5362_s20, 32 }
0x16c9   :  { %p4601_p13 = scmp.ne.s32.totalorder %s5362_s20, %s4600_s23  ;;  %p4604_p0 = scmp.lt.u32.totalorder %s4600_s23, %s5362_s20 }
0x16cb   :  { %p4606_p1 = pnand %p4604_p0, %p4601_p13 }
0x16cd   :  { %4609 = shalt.err (!%p4606_p1)
}
0x16ce   :  { %3635 = dma.vmem_to_hbm [thread:$0]  %s3633_s18, 32, %s5362_s20, [#allocation6]  }
0x16cf   :  { %4620 = dma.done.wait [#allocation6], 32  }
0x16d0   :  { %4621 = vsyncadd [#allocation6], 4294967264 }
0x16d1   :  { %3639 = vsyncpa [#allocation5], 1 }
0x16d2   :  { %3640 = vsyncpa [#allocation8], 1 }
0x16d3   :  { %3641 = vsyncpa [#allocation11], 1 }
0x16d4   :  { %3642 = vsyncpa [#allocation14], 1 }
0x16d5   :  { %3643 = vsyncpa [#allocation17], 1 }
0x16d6   :  { %3644 = vsyncpa [#allocation6], 1 }

</bundles_post_ra>
